<compile_context>
chip_gen: v7x
topology: tpu7x:2x2x1
jax: 0.10.0
libtpu: 0.0.40
codegen_flags: <defaults>
</compile_context>

<pallas_src>
import functools

import jax
import jax.numpy as jnp
from jax.experimental import pallas as pl
from jax.experimental.pallas import tpu as pltpu

_NEG_BIG = -1e30   # finite "-inf" sentinel: keeps max()/exp() arithmetic NaN-free


def _attention_kernel(b_a1_ref,                               # SMEM (1,) f32
                      s_ref, uh_ref, xs_ref, mask_ref,        # VMEM inputs
                      w_sa_ref, b_sa_ref, w_a1_ref,
                      e_ref, m_out_ref, den_out_ref, attend_ref,   # outputs
                      proj_ref, acc_ref, den_ref, m_ref,      # VMEM scratch
                      *, xs_seq_major: bool):
    # grid = (batch tiles "parallel", L tiles "arbitrary"); L iterates innermost.
    i = pl.program_id(1)

    @pl.when(i == 0)
    def _init():
        # sa(s_tm1): computed once per batch tile, reused for every L tile.
        proj_ref[...] = (jnp.dot(s_ref[...], w_sa_ref[...],
                                 preferred_element_type=jnp.float32)
                         + b_sa_ref[...])
        acc_ref[...] = jnp.zeros_like(acc_ref)
        den_ref[...] = jnp.zeros_like(den_ref)
        m_ref[...] = jnp.full(m_ref.shape, _NEG_BIG, jnp.float32)

    # ---- scores from the native seq-major uh block (tl, tb, A), A on lanes ----
    u = uh_ref[...].astype(jnp.float32)                         # bf16 -> f32
    t = jnp.tanh(proj_ref[...] + u)                             # (tl, tb, A)
    scores = jnp.sum(t * w_a1_ref[...], axis=-1) + b_a1_ref[0]  # (tl, tb)
    scores = scores.T                                           # (tb, tl) lane-dense

    # ---- online softmax: per-column running max across L tiles ----
    mask = mask_ref[...]                                        # (tb, tl)
    sm = jnp.where(mask > 0, scores, _NEG_BIG)
    m_prev = m_ref[...]                                         # (tb, 1)
    m_new = jnp.maximum(m_prev, jnp.max(sm, axis=-1, keepdims=True))
    alpha = jnp.exp(m_prev - m_new)                             # rescale, <= 1
    p = jnp.exp(sm - m_new) * mask                              # (tb, tl)

    den_ref[...] = alpha * den_ref[...] + jnp.sum(p, axis=-1, keepdims=True)
    m_ref[...] = m_new
    e_ref[...] = p                                              # unnormalized e block
    m_out_ref[...] = jnp.broadcast_to(m_new, m_out_ref.shape)   # per-tile max (fixup)

    # ---- attend contribution ----
    xs = xs_ref[...].astype(jnp.float32)
    if xs_seq_major:
        # xs block (tl, tb, E) in native layout: VPU multiply + reduce over L
        # (no M=1 MXU matmuls, no relayout of the big block).
        contrib = jnp.sum(p.T[:, :, None] * xs, axis=0)         # (tb, E)
    else:
        # Fallback layout: xs block (tb, tl, E); per-batch (1, tl) @ (tl, E).
        contrib = jnp.einsum('bqt,bte->bqe', p[:, None, :], xs,
                             preferred_element_type=jnp.float32)[:, 0, :]
    acc_ref[...] = alpha * acc_ref[...] + contrib

    @pl.when(i == pl.num_programs(1) - 1)
    def _finalize():
        d = jnp.maximum(den_ref[...], 1e-30)    # all-masked columns -> 0, not NaN
        attend_ref[...] = acc_ref[...] / d
        den_out_ref[...] = den_ref[...]


def _vmem_budget():
    """Generation-aware VMEM sizing (v5e/v6e: 128 MiB, v7x: 64 MiB per core)."""
    try:
        cap = int(pltpu.get_tpu_info().vmem_capacity_bytes)
    except Exception:
        cap = 64 * 1024 * 1024                 # conservative default (v7x)
    limit = min((cap * 3) // 4, 100 * 1024 * 1024)
    budget = (limit * 2) // 5                  # headroom for Mosaic temporaries
    return budget, limit


def _choose_b_tile(B):
    # tb must divide B and (be a multiple of 16 or equal B) so bf16 uh/xs blocks
    # keep aligned minor dims.  Prefer >= 2 batch tiles so the "parallel" grid
    # axis can be split across TensorCores (v7x megacore).
    if B >= 32:
        for tb in (128, 96, 64, 48, 32, 16):
            if tb <= B // 2 and B % tb == 0:
                return tb
    return B


def _choose_l_tile(L, tb, A, E, itemsize, budget_bytes):
    """Largest L tile within the VMEM budget (kernel is HBM-bandwidth-bound).
    Multiple of 128 when more than one tile is needed (lane-dense mask/e
    blocks); pads L only if no clean divisor exists (padded rows carry mask=0).
    The per-row estimate covers double-buffered inputs + f32 kernel temps."""
    row = tb * ((A + E) * (2 * itemsize + 20) + 64)
    max_rows = max(128, budget_bytes // row)
    if L <= max_rows:
        return L, L                            # single block, no padding
    cap = (min(max_rows, 2048) // 128) * 128
    t = cap
    while t >= max(128, cap // 2):             # prefer an exact divisor of L
        if L % t == 0:
            return t, L
        t -= 128
    l_pad = ((L + cap - 1) // cap) * cap
    return cap, l_pad


def attention_forward(s_tm1, xs_h, uh, w_sa, b_sa, w_a1, b_a1, xs_mask=None, *,
                      l_tile=None, b_tile=None, stream_dtype=jnp.bfloat16):
    """Pallas forward of Attention. Returns (e_ij (L, B), attend (B, E))."""
    f32 = jnp.float32
    uh = jnp.asarray(uh)
    xs_h = jnp.asarray(xs_h)
    L, B, A = uh.shape
    E = xs_h.shape[-1]
    s_tm1 = jnp.asarray(s_tm1, f32)
    H = s_tm1.shape[-1]
    if xs_mask is None:
        xs_mask = jnp.ones((L, B), f32)

    # Big operands stream in native (L, B, feat) layout and in bf16: no HBM
    # transpose pass, half the HBM bytes.  In-kernel compute stays f32.
    uh_s = uh.astype(stream_dtype)
    xs_s = xs_h.astype(stream_dtype)
    mask_bl = jnp.asarray(xs_mask, f32).T                 # (B, L): tiny array only

    # PyTorch nn.Linear stores weight as (out, in); transpose to (in, out).
    w_sa_t = jnp.asarray(w_sa, f32).T                     # (H, A)
    b_sa_2d = jnp.asarray(b_sa, f32).reshape(1, A)
    w_a1_2d = jnp.asarray(w_a1, f32).reshape(1, A)
    b_a1_s = jnp.asarray(b_a1, f32).reshape(1)            # SMEM scalar (cancels, kept for fidelity)

    itemsize = jnp.dtype(stream_dtype).itemsize
    budget, vmem_limit = _vmem_budget()

    tb = _choose_b_tile(B) if b_tile is None else int(b_tile)
    if B % tb != 0 or (tb != B and tb % 16 != 0):
        raise ValueError("b_tile must divide B and be a multiple of 16 (or == B)")

    if l_tile is None:
        tl, l_pad = _choose_l_tile(L, tb, A, E, itemsize, budget)
    else:
        tl = int(l_tile)
        if tl != L and tl % 128 != 0:
            raise ValueError("l_tile must be a multiple of 128 (or == L)")
        l_pad = ((L + tl - 1) // tl) * tl

    if l_pad != L:   # padded rows carry mask = 0 -> contribute nothing
        uh_s = jnp.pad(uh_s, ((0, l_pad - L), (0, 0), (0, 0)))
        xs_s = jnp.pad(xs_s, ((0, l_pad - L), (0, 0), (0, 0)))
        mask_bl = jnp.pad(mask_bl, ((0, 0), (0, l_pad - L)))

    grid = (B // tb, l_pad // tl)
    cost = pl.CostEstimate(
        flops=int(2 * B * H * A + 2 * L * B * (A + E) + 8 * L * B),
        transcendentals=int(L * B * (A + 1)),
        bytes_accessed=int(L * B * (A + E) * itemsize + 3 * L * B * 4
                           + B * (H + E + 2) * 4 + (H + 2) * A * 4),
    )
    cparams = pltpu.CompilerParams(
        dimension_semantics=("parallel", "arbitrary"),
        vmem_limit_bytes=int(vmem_limit))

    def run(xs_seq_major):
        if xs_seq_major:
            xs_arr = xs_s                                            # (l_pad, B, E)
            xs_spec = pl.BlockSpec((tl, tb, E), lambda b, i: (i, b, 0))
        else:
            xs_arr = jnp.transpose(xs_s, (1, 0, 2))                  # (B, l_pad, E)
            xs_spec = pl.BlockSpec((tb, tl, E), lambda b, i: (b, i, 0))
        out = pl.pallas_call(
            functools.partial(_attention_kernel, xs_seq_major=xs_seq_major),
            out_shape=(jax.ShapeDtypeStruct((B, l_pad), f32),    # e (unnormalized)
                       jax.ShapeDtypeStruct((B, l_pad), f32),    # per-tile running max
                       jax.ShapeDtypeStruct((B, 1), f32),        # exp-sum denominator
                       jax.ShapeDtypeStruct((B, E), f32)),       # attend
            grid=grid,
            in_specs=[
                pl.BlockSpec(memory_space=pltpu.MemorySpace.SMEM),    # a1.bias
                pl.BlockSpec((tb, H), lambda b, i: (b, 0)),           # s_tm1
                pl.BlockSpec((tl, tb, A), lambda b, i: (i, b, 0)),    # uh (native layout)
                xs_spec,                                              # xs_h
                pl.BlockSpec((tb, tl), lambda b, i: (b, i)),          # mask
                pl.BlockSpec((H, A), lambda b, i: (0, 0)),            # sa.weight^T
                pl.BlockSpec((1, A), lambda b, i: (0, 0)),            # sa.bias
                pl.BlockSpec((1, A), lambda b, i: (0, 0)),            # a1.weight
            ],
            out_specs=(
                pl.BlockSpec((tb, tl), lambda b, i: (b, i)),          # e block
                pl.BlockSpec((tb, tl), lambda b, i: (b, i)),          # running max
                pl.BlockSpec((tb, 1), lambda b, i: (b, 0)),           # denom (resident)
                pl.BlockSpec((tb, E), lambda b, i: (b, 0)),           # attend (resident)
            ),
            scratch_shapes=[
                pltpu.VMEM((tb, A), jnp.float32),   # hoisted sa(s_tm1)
                pltpu.VMEM((tb, E), jnp.float32),   # attend accumulator (f32)
                pltpu.VMEM((tb, 1), jnp.float32),   # denominator accumulator
                pltpu.VMEM((tb, 1), jnp.float32),   # running max
            ],
            compiler_params=cparams,
            cost_estimate=cost,
        )(b_a1_s, s_tm1, uh_s, xs_arr, mask_bl, w_sa_t, b_sa_2d, w_a1_2d)
        jax.block_until_ready(out)
        return out

    try:
        # Fast path: xs_h in native (L, B, E) layout, attend reduced on the VPU.
        e_raw, m_run, den, attend = run(xs_seq_major=True)
    except Exception:
        # Fallback: batch-major xs (one extra bf16 HBM pass) + the MXU einsum
        # formulation that is known to lower on all generations.
        e_raw, m_run, den, attend = run(xs_seq_major=False)

    # Wrapper fixup on the small (B, L) arrays only: bring every e block to the
    # final max's scale, then normalize.  attend was already normalized in-kernel.
    m_fin = jnp.max(m_run, axis=-1, keepdims=True)
    e = e_raw * jnp.exp(m_run - m_fin) / jnp.maximum(den, 1e-30)
    e_ij = e[:, :L].T                                      # back to (L, B)
    return e_ij, attend


def attention_reference(s_tm1, xs_h, uh, w_sa, b_sa, w_a1, b_a1, xs_mask=None):
    """Pure-JAX reference mirroring the PyTorch forward."""
    proj = s_tm1 @ jnp.asarray(w_sa).T + b_sa                                  # (B, A)
    scores = jnp.tanh(proj[None, :, :] + uh) @ jnp.asarray(w_a1).reshape(-1) + b_a1[0]
    e = jnp.exp(scores)                                                        # (L, B)
    if xs_mask is not None:
        e = e * xs_mask
    e = e / e.sum(0)[None, :]
    attend = (e[:, :, None] * xs_h).sum(0)
    return e, attend


if __name__ == "__main__":
    def run_case(key, L, B, H, A, E, b_tile=None, l_tile=None):
        ks = jax.random.split(key, 8)
        s_tm1 = jax.random.normal(ks[0], (B, H), jnp.float32)
        uh = jax.random.normal(ks[1], (L, B, A), jnp.float32)
        xs_h = jax.random.normal(ks[2], (L, B, E), jnp.float32)
        xs_mask = (jax.random.uniform(ks[3], (L, B)) > 0.2).astype(jnp.float32)
        xs_mask = xs_mask.at[0, :].set(1.0)   # keep every batch column non-empty

        # Synthetic parameters with PyTorch nn.Linear shapes.
        w_sa = 0.1 * jax.random.normal(ks[4], (A, H), jnp.float32)   # sa.weight (out, in)
        b_sa = 0.1 * jax.random.normal(ks[5], (A,), jnp.float32)     # sa.bias
        w_a1 = 0.1 * jax.random.normal(ks[6], (1, A), jnp.float32)   # a1.weight
        b_a1 = 0.1 * jax.random.normal(ks[7], (1,), jnp.float32)     # a1.bias

        e_ij, attend = attention_forward(s_tm1, xs_h, uh, w_sa, b_sa, w_a1, b_a1,
                                         xs_mask, b_tile=b_tile, l_tile=l_tile)
        jax.block_until_ready((e_ij, attend))

        # Reference evaluated on the same bf16-rounded streams the kernel reads.
        uh_q = uh.astype(jnp.bfloat16).astype(jnp.float32)
        xs_q = xs_h.astype(jnp.bfloat16).astype(jnp.float32)
        e_ref, att_ref = attention_reference(s_tm1, xs_q, uh_q, w_sa, b_sa,
                                             w_a1, b_a1, xs_mask)
        assert e_ij.shape == (L, B) and attend.shape == (B, E)
        assert jnp.allclose(e_ij, e_ref, rtol=3e-3, atol=5e-4), "e_ij mismatch"
        assert jnp.allclose(attend, att_ref, rtol=3e-3, atol=2e-3), "attend mismatch"

    key = jax.random.PRNGKey(0)
    k1, k2, k3 = jax.random.split(key, 3)
    # Small config consistent with the module: single L tile, tb == B.
    run_case(k1, L=8, B=4, H=32, A=32, E=32)
    # Multi-tile grid: 2 batch tiles ("parallel") x 2 L tiles ("arbitrary").
    run_case(k2, L=256, B=32, H=64, A=128, E=128, b_tile=16, l_tile=128)
    # Ragged L exercising the padded-tail path (L=200 -> padded to 256).
    run_case(k3, L=200, B=8, H=64, A=128, E=96, l_tile=128)

    print("KERNEL_OK")
</pallas_src>

<mosaic_0001>
module attributes {stable_mosaic.version = 11 : i64} {
  func.func @_attention_kernel(%arg0: i32, %arg1: i32, %arg2: memref<1xf32, #tpu.memory_space<smem>>, %arg3: memref<4x32xf32, #tpu.memory_space<vmem>>, %arg4: memref<8x4x32xbf16, #tpu.memory_space<vmem>>, %arg5: memref<8x4x32xbf16, #tpu.memory_space<vmem>>, %arg6: memref<4x8xf32, #tpu.memory_space<vmem>>, %arg7: memref<32x32xf32, #tpu.memory_space<vmem>>, %arg8: memref<1x32xf32, #tpu.memory_space<vmem>>, %arg9: memref<1x32xf32, #tpu.memory_space<vmem>>, %arg10: memref<4x8xf32, #tpu.memory_space<vmem>>, %arg11: memref<4x8xf32, #tpu.memory_space<vmem>>, %arg12: memref<4x1xf32, #tpu.memory_space<vmem>>, %arg13: memref<4x32xf32, #tpu.memory_space<vmem>>, %arg14: memref<4x32xf32, #tpu.memory_space<vmem>>, %arg15: memref<4x32xf32, #tpu.memory_space<vmem>>, %arg16: memref<4x1xf32, #tpu.memory_space<vmem>>, %arg17: memref<4x1xf32, #tpu.memory_space<vmem>>) attributes {dimension_semantics = [#tpu.dimension_semantics<parallel>, #tpu.dimension_semantics<arbitrary>], iteration_bounds = array<i64: 1, 1>, scalar_prefetch = 0 : i64, scratch_operands = 4 : i64, tpu.core_type = #tpu.core_type<tc>, window_params = [{transform_indices = @transform_0, window_bounds = array<i64: 1>}, {transform_indices = @transform_1, window_bounds = array<i64: 4, 32>}, {transform_indices = @transform_2, window_bounds = array<i64: 8, 4, 32>}, {transform_indices = @transform_3, window_bounds = array<i64: 8, 4, 32>}, {transform_indices = @transform_4, window_bounds = array<i64: 4, 8>}, {pipeline_mode = #tpu.pipeline_mode<synchronous>, transform_indices = @transform_5, window_bounds = array<i64: 32, 32>}, {pipeline_mode = #tpu.pipeline_mode<synchronous>, transform_indices = @transform_6, window_bounds = array<i64: 1, 32>}, {pipeline_mode = #tpu.pipeline_mode<synchronous>, transform_indices = @transform_7, window_bounds = array<i64: 1, 32>}, {transform_indices = @transform_8, window_bounds = array<i64: 4, 8>}, {transform_indices = @transform_9, window_bounds = array<i64: 4, 8>}, {transform_indices = @transform_10, window_bounds = array<i64: 4, 1>}, {transform_indices = @transform_11, window_bounds = array<i64: 4, 32>}]} {
    %c0_i32 = arith.constant 0 : i32
    %0 = arith.cmpi eq, %arg1, %c0_i32 : i32
    %1 = arith.extui %0 : i1 to i32
    %c0_i32_0 = arith.constant 0 : i32
    %2 = arith.cmpi ne, %1, %c0_i32_0 : i32
    scf.if %2 {
      %c0_36 = arith.constant 0 : index
      %c0_37 = arith.constant 0 : index
      %60 = vector.load %arg3[%c0_36, %c0_37] : memref<4x32xf32, #tpu.memory_space<vmem>>, vector<4x32xf32>
      %c0_38 = arith.constant 0 : index
      %c0_39 = arith.constant 0 : index
      %61 = vector.load %arg7[%c0_38, %c0_39] : memref<32x32xf32, #tpu.memory_space<vmem>>, vector<32x32xf32>
      %cst_40 = arith.constant dense<0.000000e+00> : vector<4x32xf32>
      %62 = tpu.matmul %60, %61, %cst_40 {dimension_numbers = #tpu.dot_dimension_numbers<[1], [0], [0], [1], [0, 0, 1, 1], [], []>} : vector<4x32xf32>, vector<32x32xf32>, vector<4x32xf32> -> vector<4x32xf32>
      %c0_41 = arith.constant 0 : index
      %c0_42 = arith.constant 0 : index
      %63 = vector.load %arg8[%c0_41, %c0_42] : memref<1x32xf32, #tpu.memory_space<vmem>>, vector<1x32xf32>
      %64 = vector.broadcast %63 : vector<1x32xf32> to vector<4x32xf32>
      %65 = arith.addf %62, %64 : vector<4x32xf32>
      %c0_43 = arith.constant 0 : index
      %c0_44 = arith.constant 0 : index
      %66 = vector.load %arg14[%c0_43, %c0_44] : memref<4x32xf32, #tpu.memory_space<vmem>>, vector<4x32xf32>
      tpu.vector_store %arg14[%c0_43, %c0_44], %65 {strides = array<i32>} : memref<4x32xf32, #tpu.memory_space<vmem>>, vector<4x32xf32>,
      %cst_45 = arith.constant 0.000000e+00 : f32
      %67 = vector.broadcast %cst_45 : f32 to vector<4x32xf32>
      %c0_46 = arith.constant 0 : index
      %c0_47 = arith.constant 0 : index
      %68 = vector.load %arg15[%c0_46, %c0_47] : memref<4x32xf32, #tpu.memory_space<vmem>>, vector<4x32xf32>
      tpu.vector_store %arg15[%c0_46, %c0_47], %67 {strides = array<i32>} : memref<4x32xf32, #tpu.memory_space<vmem>>, vector<4x32xf32>,
      %cst_48 = arith.constant 0.000000e+00 : f32
      %69 = vector.broadcast %cst_48 : f32 to vector<4x1xf32>
      %c0_49 = arith.constant 0 : index
      %c0_50 = arith.constant 0 : index
      %70 = vector.load %arg16[%c0_49, %c0_50] : memref<4x1xf32, #tpu.memory_space<vmem>>, vector<4x1xf32>
      tpu.vector_store %arg16[%c0_49, %c0_50], %69 {strides = array<i32>} : memref<4x1xf32, #tpu.memory_space<vmem>>, vector<4x1xf32>,
      %cst_51 = arith.constant -1.000000e+30 : f32
      %71 = vector.broadcast %cst_51 : f32 to vector<4x1xf32>
      %c0_52 = arith.constant 0 : index
      %c0_53 = arith.constant 0 : index
      %72 = vector.load %arg17[%c0_52, %c0_53] : memref<4x1xf32, #tpu.memory_space<vmem>>, vector<4x1xf32>
      tpu.vector_store %arg17[%c0_52, %c0_53], %71 {strides = array<i32>} : memref<4x1xf32, #tpu.memory_space<vmem>>, vector<4x1xf32>,
    } else {
    }
    %c0 = arith.constant 0 : index
    %c0_1 = arith.constant 0 : index
    %c0_2 = arith.constant 0 : index
    %3 = vector.load %arg4[%c0, %c0_1, %c0_2] : memref<8x4x32xbf16, #tpu.memory_space<vmem>>, vector<8x4x32xbf16>
    %4 = arith.extf %3 : vector<8x4x32xbf16> to vector<8x4x32xf32>
    %c0_3 = arith.constant 0 : index
    %c0_4 = arith.constant 0 : index
    %5 = vector.load %arg14[%c0_3, %c0_4] : memref<4x32xf32, #tpu.memory_space<vmem>>, vector<4x32xf32>
    %6 = vector.shape_cast %5 : vector<4x32xf32> to vector<1x4x32xf32>
    %7 = vector.broadcast %6 : vector<1x4x32xf32> to vector<8x4x32xf32>
    %8 = arith.addf %7, %4 : vector<8x4x32xf32>
    %9 = math.tanh %8 : vector<8x4x32xf32>
    %c0_5 = arith.constant 0 : index
    %c0_6 = arith.constant 0 : index
    %10 = vector.load %arg9[%c0_5, %c0_6] : memref<1x32xf32, #tpu.memory_space<vmem>>, vector<1x32xf32>
    %11 = vector.shape_cast %10 : vector<1x32xf32> to vector<1x1x32xf32>
    %12 = vector.broadcast %11 : vector<1x1x32xf32> to vector<8x4x32xf32>
    %13 = arith.mulf %9, %12 : vector<8x4x32xf32>
    %cst = arith.constant dense<0.000000e+00> : vector<8x4xf32>
    %14 = vector.multi_reduction <add>, %13, %cst [2] : vector<8x4x32xf32> to vector<8x4xf32>
    %c0_7 = arith.constant 0 : index
    %15 = memref.load %arg2[%c0_7] : memref<1xf32, #tpu.memory_space<smem>>
    %16 = vector.broadcast %15 : f32 to vector<8x4xf32>
    %17 = arith.addf %14, %16 : vector<8x4xf32>
    %18 = tpu.transpose %17, [1, 0] : vector<8x4xf32> -> vector<4x8xf32>
    %c0_8 = arith.constant 0 : index
    %c0_9 = arith.constant 0 : index
    %19 = vector.load %arg6[%c0_8, %c0_9] : memref<4x8xf32, #tpu.memory_space<vmem>>, vector<4x8xf32>
    %cst_10 = arith.constant 0.000000e+00 : f32
    %20 = vector.broadcast %cst_10 : f32 to vector<4x8xf32>
    %21 = arith.cmpf ogt, %19, %20 : vector<4x8xf32>
    %cst_11 = arith.constant -1.000000e+30 : f32
    %22 = vector.broadcast %cst_11 : f32 to vector<4x8xf32>
    %23 = arith.select %21, %18, %22 : vector<4x8xi1>, vector<4x8xf32>
    %c0_12 = arith.constant 0 : index
    %c0_13 = arith.constant 0 : index
    %24 = vector.load %arg17[%c0_12, %c0_13] : memref<4x1xf32, #tpu.memory_space<vmem>>, vector<4x1xf32>
    %cst_14 = arith.constant dense<0xFF800000> : vector<4xf32>
    %25 = vector.multi_reduction <maximumf>, %23, %cst_14 [1] : vector<4x8xf32> to vector<4xf32>
    %26 = vector.shape_cast %25 : vector<4xf32> to vector<4x1xf32>
    %27 = arith.maximumf %24, %26 : vector<4x1xf32>
    %28 = arith.subf %24, %27 : vector<4x1xf32>
    %29 = math.exp %28 : vector<4x1xf32>
    %30 = vector.broadcast %27 : vector<4x1xf32> to vector<4x8xf32>
    %31 = arith.subf %23, %30 : vector<4x8xf32>
    %32 = math.exp %31 : vector<4x8xf32>
    %33 = arith.mulf %32, %19 : vector<4x8xf32>
    %c0_15 = arith.constant 0 : index
    %c0_16 = arith.constant 0 : index
    %34 = vector.load %arg16[%c0_15, %c0_16] : memref<4x1xf32, #tpu.memory_space<vmem>>, vector<4x1xf32>
    %35 = arith.mulf %29, %34 : vector<4x1xf32>
    %cst_17 = arith.constant dense<0.000000e+00> : vector<4xf32>
    %36 = vector.multi_reduction <add>, %33, %cst_17 [1] : vector<4x8xf32> to vector<4xf32>
    %37 = vector.shape_cast %36 : vector<4xf32> to vector<4x1xf32>
    %38 = arith.addf %35, %37 : vector<4x1xf32>
    %c0_18 = arith.constant 0 : index
    %c0_19 = arith.constant 0 : index
    %39 = vector.load %arg16[%c0_18, %c0_19] : memref<4x1xf32, #tpu.memory_space<vmem>>, vector<4x1xf32>
    tpu.vector_store %arg16[%c0_18, %c0_19], %38 {strides = array<i32>} : memref<4x1xf32, #tpu.memory_space<vmem>>, vector<4x1xf32>,
    %c0_20 = arith.constant 0 : index
    %c0_21 = arith.constant 0 : index
    %40 = vector.load %arg17[%c0_20, %c0_21] : memref<4x1xf32, #tpu.memory_space<vmem>>, vector<4x1xf32>
    tpu.vector_store %arg17[%c0_20, %c0_21], %27 {strides = array<i32>} : memref<4x1xf32, #tpu.memory_space<vmem>>, vector<4x1xf32>,
    %c0_22 = arith.constant 0 : index
    %c0_23 = arith.constant 0 : index
    %41 = vector.load %arg10[%c0_22, %c0_23] : memref<4x8xf32, #tpu.memory_space<vmem>>, vector<4x8xf32>
    tpu.vector_store %arg10[%c0_22, %c0_23], %33 {strides = array<i32>} : memref<4x8xf32, #tpu.memory_space<vmem>>, vector<4x8xf32>,
    %42 = vector.shape_cast %27 : vector<4x1xf32> to vector<4x1xf32>
    %43 = vector.broadcast %42 : vector<4x1xf32> to vector<4x8xf32>
    %c0_24 = arith.constant 0 : index
    %c0_25 = arith.constant 0 : index
    %44 = vector.load %arg11[%c0_24, %c0_25] : memref<4x8xf32, #tpu.memory_space<vmem>>, vector<4x8xf32>
    tpu.vector_store %arg11[%c0_24, %c0_25], %43 {strides = array<i32>} : memref<4x8xf32, #tpu.memory_space<vmem>>, vector<4x8xf32>,
    %c0_26 = arith.constant 0 : index
    %c0_27 = arith.constant 0 : index
    %c0_28 = arith.constant 0 : index
    %45 = vector.load %arg5[%c0_26, %c0_27, %c0_28] : memref<8x4x32xbf16, #tpu.memory_space<vmem>>, vector<8x4x32xbf16>
    %46 = arith.extf %45 : vector<8x4x32xbf16> to vector<8x4x32xf32>
    %47 = tpu.transpose %33, [1, 0] : vector<4x8xf32> -> vector<8x4xf32>
    %48 = vector.shape_cast %47 : vector<8x4xf32> to vector<8x4x1xf32>
    %49 = vector.broadcast %48 : vector<8x4x1xf32> to vector<8x4x32xf32>
    %50 = arith.mulf %49, %46 : vector<8x4x32xf32>
    %cst_29 = arith.constant dense<0.000000e+00> : vector<4x32xf32>
    %51 = vector.multi_reduction <add>, %50, %cst_29 [0] : vector<8x4x32xf32> to vector<4x32xf32>
    %c0_30 = arith.constant 0 : index
    %c0_31 = arith.constant 0 : index
    %52 = vector.load %arg15[%c0_30, %c0_31] : memref<4x32xf32, #tpu.memory_space<vmem>>, vector<4x32xf32>
    %53 = vector.broadcast %29 : vector<4x1xf32> to vector<4x32xf32>
    %54 = arith.mulf %53, %52 : vector<4x32xf32>
    %55 = arith.addf %54, %51 : vector<4x32xf32>
    %c0_32 = arith.constant 0 : index
    %c0_33 = arith.constant 0 : index
    %56 = vector.load %arg15[%c0_32, %c0_33] : memref<4x32xf32, #tpu.memory_space<vmem>>, vector<4x32xf32>
    tpu.vector_store %arg15[%c0_32, %c0_33], %55 {strides = array<i32>} : memref<4x32xf32, #tpu.memory_space<vmem>>, vector<4x32xf32>,
    %c0_i32_34 = arith.constant 0 : i32
    %57 = arith.cmpi eq, %arg1, %c0_i32_34 : i32
    %58 = arith.extui %57 : i1 to i32
    %c0_i32_35 = arith.constant 0 : i32
    %59 = arith.cmpi ne, %58, %c0_i32_35 : i32
    scf.if %59 {
      %c0_36 = arith.constant 0 : index
      %c0_37 = arith.constant 0 : index
      %60 = vector.load %arg16[%c0_36, %c0_37] : memref<4x1xf32, #tpu.memory_space<vmem>>, vector<4x1xf32>
      %cst_38 = arith.constant 1.000000e-30 : f32
      %61 = vector.broadcast %cst_38 : f32 to vector<4x1xf32>
      %62 = arith.maximumf %60, %61 : vector<4x1xf32>
      %c0_39 = arith.constant 0 : index
      %c0_40 = arith.constant 0 : index
      %63 = vector.load %arg15[%c0_39, %c0_40] : memref<4x32xf32, #tpu.memory_space<vmem>>, vector<4x32xf32>
      %64 = vector.broadcast %62 : vector<4x1xf32> to vector<4x32xf32>
      %65 = arith.divf %63, %64 : vector<4x32xf32>
      %c0_41 = arith.constant 0 : index
      %c0_42 = arith.constant 0 : index
      %66 = vector.load %arg13[%c0_41, %c0_42] : memref<4x32xf32, #tpu.memory_space<vmem>>, vector<4x32xf32>
      tpu.vector_store %arg13[%c0_41, %c0_42], %65 {strides = array<i32>} : memref<4x32xf32, #tpu.memory_space<vmem>>, vector<4x32xf32>,
      %c0_43 = arith.constant 0 : index
      %c0_44 = arith.constant 0 : index
      %67 = vector.load %arg16[%c0_43, %c0_44] : memref<4x1xf32, #tpu.memory_space<vmem>>, vector<4x1xf32>
      %c0_45 = arith.constant 0 : index
      %c0_46 = arith.constant 0 : index
      %68 = vector.load %arg12[%c0_45, %c0_46] : memref<4x1xf32, #tpu.memory_space<vmem>>, vector<4x1xf32>
      tpu.vector_store %arg12[%c0_45, %c0_46], %67 {strides = array<i32>} : memref<4x1xf32, #tpu.memory_space<vmem>>, vector<4x1xf32>,
    } else {
    }
    return
  }
  func.func @transform_0(%arg0: i32, %arg1: i32) -> i32 {
    %c0_i32 = arith.constant 0 : i32
    %c0_i32_0 = arith.constant 0 : i32
    return %c0_i32 : i32
  }
  func.func @transform_1(%arg0: i32, %arg1: i32) -> (i32, i32) {
    %c0_i32 = arith.constant 0 : i32
    %c0_i32_0 = arith.constant 0 : i32
    return %arg0, %c0_i32 : i32, i32
  }
  func.func @transform_2(%arg0: i32, %arg1: i32) -> (i32, i32, i32) {
    %c0_i32 = arith.constant 0 : i32
    %c0_i32_0 = arith.constant 0 : i32
    return %arg1, %arg0, %c0_i32 : i32, i32, i32
  }
  func.func @transform_3(%arg0: i32, %arg1: i32) -> (i32, i32, i32) {
    %c0_i32 = arith.constant 0 : i32
    %c0_i32_0 = arith.constant 0 : i32
    return %arg1, %arg0, %c0_i32 : i32, i32, i32
  }
  func.func @transform_4(%arg0: i32, %arg1: i32) -> (i32, i32) {
    %c0_i32 = arith.constant 0 : i32
    return %arg0, %arg1 : i32, i32
  }
  func.func @transform_5(%arg0: i32, %arg1: i32) -> (i32, i32) {
    %c0_i32 = arith.constant 0 : i32
    %c0_i32_0 = arith.constant 0 : i32
    %c0_i32_1 = arith.constant 0 : i32
    return %c0_i32, %c0_i32_0 : i32, i32
  }
  func.func @transform_6(%arg0: i32, %arg1: i32) -> (i32, i32) {
    %c0_i32 = arith.constant 0 : i32
    %c0_i32_0 = arith.constant 0 : i32
    %c0_i32_1 = arith.constant 0 : i32
    return %c0_i32, %c0_i32_0 : i32, i32
  }
  func.func @transform_7(%arg0: i32, %arg1: i32) -> (i32, i32) {
    %c0_i32 = arith.constant 0 : i32
    %c0_i32_0 = arith.constant 0 : i32
    %c0_i32_1 = arith.constant 0 : i32
    return %c0_i32, %c0_i32_0 : i32, i32
  }
  func.func @transform_8(%arg0: i32, %arg1: i32) -> (i32, i32) {
    %c0_i32 = arith.constant 0 : i32
    return %arg0, %arg1 : i32, i32
  }
  func.func @transform_9(%arg0: i32, %arg1: i32) -> (i32, i32) {
    %c0_i32 = arith.constant 0 : i32
    return %arg0, %arg1 : i32, i32
  }
  func.func @transform_10(%arg0: i32, %arg1: i32) -> (i32, i32) {
    %c0_i32 = arith.constant 0 : i32
    %c0_i32_0 = arith.constant 0 : i32
    return %arg0, %c0_i32 : i32, i32
  }
  func.func @transform_11(%arg0: i32, %arg1: i32) -> (i32, i32) {
    %c0_i32 = arith.constant 0 : i32
    %c0_i32_0 = arith.constant 0 : i32
    return %arg0, %c0_i32 : i32, i32
  }
}

module attributes {stable_mosaic.version = 11 : i64} {
  func.func @_attention_kernel(%arg0: i32, %arg1: i32, %arg2: memref<1xf32, #tpu.memory_space<smem>>, %arg3: memref<4x32xf32, #tpu.memory_space<vmem>>, %arg4: memref<8x4x32xbf16, #tpu.memory_space<vmem>>, %arg5: memref<4x8x32xbf16, #tpu.memory_space<vmem>>, %arg6: memref<4x8xf32, #tpu.memory_space<vmem>>, %arg7: memref<32x32xf32, #tpu.memory_space<vmem>>, %arg8: memref<1x32xf32, #tpu.memory_space<vmem>>, %arg9: memref<1x32xf32, #tpu.memory_space<vmem>>, %arg10: memref<4x8xf32, #tpu.memory_space<vmem>>, %arg11: memref<4x8xf32, #tpu.memory_space<vmem>>, %arg12: memref<4x1xf32, #tpu.memory_space<vmem>>, %arg13: memref<4x32xf32, #tpu.memory_space<vmem>>, %arg14: memref<4x32xf32, #tpu.memory_space<vmem>>, %arg15: memref<4x32xf32, #tpu.memory_space<vmem>>, %arg16: memref<4x1xf32, #tpu.memory_space<vmem>>, %arg17: memref<4x1xf32, #tpu.memory_space<vmem>>) attributes {dimension_semantics = [#tpu.dimension_semantics<parallel>, #tpu.dimension_semantics<arbitrary>], iteration_bounds = array<i64: 1, 1>, scalar_prefetch = 0 : i64, scratch_operands = 4 : i64, tpu.core_type = #tpu.core_type<tc>, window_params = [{transform_indices = @transform_0, window_bounds = array<i64: 1>}, {transform_indices = @transform_1, window_bounds = array<i64: 4, 32>}, {transform_indices = @transform_2, window_bounds = array<i64: 8, 4, 32>}, {transform_indices = @transform_3, window_bounds = array<i64: 4, 8, 32>}, {transform_indices = @transform_4, window_bounds = array<i64: 4, 8>}, {pipeline_mode = #tpu.pipeline_mode<synchronous>, transform_indices = @transform_5, window_bounds = array<i64: 32, 32>}, {pipeline_mode = #tpu.pipeline_mode<synchronous>, transform_indices = @transform_6, window_bounds = array<i64: 1, 32>}, {pipeline_mode = #tpu.pipeline_mode<synchronous>, transform_indices = @transform_7, window_bounds = array<i64: 1, 32>}, {transform_indices = @transform_8, window_bounds = array<i64: 4, 8>}, {transform_indices = @transform_9, window_bounds = array<i64: 4, 8>}, {transform_indices = @transform_10, window_bounds = array<i64: 4, 1>}, {transform_indices = @transform_11, window_bounds = array<i64: 4, 32>}]} {
    %c0_i32 = arith.constant 0 : i32
    %0 = arith.cmpi eq, %arg1, %c0_i32 : i32
    %1 = arith.extui %0 : i1 to i32
    %c0_i32_0 = arith.constant 0 : i32
    %2 = arith.cmpi ne, %1, %c0_i32_0 : i32
    scf.if %2 {
      %c0_36 = arith.constant 0 : index
      %c0_37 = arith.constant 0 : index
      %58 = vector.load %arg3[%c0_36, %c0_37] : memref<4x32xf32, #tpu.memory_space<vmem>>, vector<4x32xf32>
      %c0_38 = arith.constant 0 : index
      %c0_39 = arith.constant 0 : index
      %59 = vector.load %arg7[%c0_38, %c0_39] : memref<32x32xf32, #tpu.memory_space<vmem>>, vector<32x32xf32>
      %cst_40 = arith.constant dense<0.000000e+00> : vector<4x32xf32>
      %60 = tpu.matmul %58, %59, %cst_40 {dimension_numbers = #tpu.dot_dimension_numbers<[1], [0], [0], [1], [0, 0, 1, 1], [], []>} : vector<4x32xf32>, vector<32x32xf32>, vector<4x32xf32> -> vector<4x32xf32>
      %c0_41 = arith.constant 0 : index
      %c0_42 = arith.constant 0 : index
      %61 = vector.load %arg8[%c0_41, %c0_42] : memref<1x32xf32, #tpu.memory_space<vmem>>, vector<1x32xf32>
      %62 = vector.broadcast %61 : vector<1x32xf32> to vector<4x32xf32>
      %63 = arith.addf %60, %62 : vector<4x32xf32>
      %c0_43 = arith.constant 0 : index
      %c0_44 = arith.constant 0 : index
      %64 = vector.load %arg14[%c0_43, %c0_44] : memref<4x32xf32, #tpu.memory_space<vmem>>, vector<4x32xf32>
      tpu.vector_store %arg14[%c0_43, %c0_44], %63 {strides = array<i32>} : memref<4x32xf32, #tpu.memory_space<vmem>>, vector<4x32xf32>,
      %cst_45 = arith.constant 0.000000e+00 : f32
      %65 = vector.broadcast %cst_45 : f32 to vector<4x32xf32>
      %c0_46 = arith.constant 0 : index
      %c0_47 = arith.constant 0 : index
      %66 = vector.load %arg15[%c0_46, %c0_47] : memref<4x32xf32, #tpu.memory_space<vmem>>, vector<4x32xf32>
      tpu.vector_store %arg15[%c0_46, %c0_47], %65 {strides = array<i32>} : memref<4x32xf32, #tpu.memory_space<vmem>>, vector<4x32xf32>,
      %cst_48 = arith.constant 0.000000e+00 : f32
      %67 = vector.broadcast %cst_48 : f32 to vector<4x1xf32>
      %c0_49 = arith.constant 0 : index
      %c0_50 = arith.constant 0 : index
      %68 = vector.load %arg16[%c0_49, %c0_50] : memref<4x1xf32, #tpu.memory_space<vmem>>, vector<4x1xf32>
      tpu.vector_store %arg16[%c0_49, %c0_50], %67 {strides = array<i32>} : memref<4x1xf32, #tpu.memory_space<vmem>>, vector<4x1xf32>,
      %cst_51 = arith.constant -1.000000e+30 : f32
      %69 = vector.broadcast %cst_51 : f32 to vector<4x1xf32>
      %c0_52 = arith.constant 0 : index
      %c0_53 = arith.constant 0 : index
      %70 = vector.load %arg17[%c0_52, %c0_53] : memref<4x1xf32, #tpu.memory_space<vmem>>, vector<4x1xf32>
      tpu.vector_store %arg17[%c0_52, %c0_53], %69 {strides = array<i32>} : memref<4x1xf32, #tpu.memory_space<vmem>>, vector<4x1xf32>,
    } else {
    }
    %c0 = arith.constant 0 : index
    %c0_1 = arith.constant 0 : index
    %c0_2 = arith.constant 0 : index
    %3 = vector.load %arg4[%c0, %c0_1, %c0_2] : memref<8x4x32xbf16, #tpu.memory_space<vmem>>, vector<8x4x32xbf16>
    %4 = arith.extf %3 : vector<8x4x32xbf16> to vector<8x4x32xf32>
    %c0_3 = arith.constant 0 : index
    %c0_4 = arith.constant 0 : index
    %5 = vector.load %arg14[%c0_3, %c0_4] : memref<4x32xf32, #tpu.memory_space<vmem>>, vector<4x32xf32>
    %6 = vector.shape_cast %5 : vector<4x32xf32> to vector<1x4x32xf32>
    %7 = vector.broadcast %6 : vector<1x4x32xf32> to vector<8x4x32xf32>
    %8 = arith.addf %7, %4 : vector<8x4x32xf32>
    %9 = math.tanh %8 : vector<8x4x32xf32>
    %c0_5 = arith.constant 0 : index
    %c0_6 = arith.constant 0 : index
    %10 = vector.load %arg9[%c0_5, %c0_6] : memref<1x32xf32, #tpu.memory_space<vmem>>, vector<1x32xf32>
    %11 = vector.shape_cast %10 : vector<1x32xf32> to vector<1x1x32xf32>
    %12 = vector.broadcast %11 : vector<1x1x32xf32> to vector<8x4x32xf32>
    %13 = arith.mulf %9, %12 : vector<8x4x32xf32>
    %cst = arith.constant dense<0.000000e+00> : vector<8x4xf32>
    %14 = vector.multi_reduction <add>, %13, %cst [2] : vector<8x4x32xf32> to vector<8x4xf32>
    %c0_7 = arith.constant 0 : index
    %15 = memref.load %arg2[%c0_7] : memref<1xf32, #tpu.memory_space<smem>>
    %16 = vector.broadcast %15 : f32 to vector<8x4xf32>
    %17 = arith.addf %14, %16 : vector<8x4xf32>
    %18 = tpu.transpose %17, [1, 0] : vector<8x4xf32> -> vector<4x8xf32>
    %c0_8 = arith.constant 0 : index
    %c0_9 = arith.constant 0 : index
    %19 = vector.load %arg6[%c0_8, %c0_9] : memref<4x8xf32, #tpu.memory_space<vmem>>, vector<4x8xf32>
    %cst_10 = arith.constant 0.000000e+00 : f32
    %20 = vector.broadcast %cst_10 : f32 to vector<4x8xf32>
    %21 = arith.cmpf ogt, %19, %20 : vector<4x8xf32>
    %cst_11 = arith.constant -1.000000e+30 : f32
    %22 = vector.broadcast %cst_11 : f32 to vector<4x8xf32>
    %23 = arith.select %21, %18, %22 : vector<4x8xi1>, vector<4x8xf32>
    %c0_12 = arith.constant 0 : index
    %c0_13 = arith.constant 0 : index
    %24 = vector.load %arg17[%c0_12, %c0_13] : memref<4x1xf32, #tpu.memory_space<vmem>>, vector<4x1xf32>
    %cst_14 = arith.constant dense<0xFF800000> : vector<4xf32>
    %25 = vector.multi_reduction <maximumf>, %23, %cst_14 [1] : vector<4x8xf32> to vector<4xf32>
    %26 = vector.shape_cast %25 : vector<4xf32> to vector<4x1xf32>
    %27 = arith.maximumf %24, %26 : vector<4x1xf32>
    %28 = arith.subf %24, %27 : vector<4x1xf32>
    %29 = math.exp %28 : vector<4x1xf32>
    %30 = vector.broadcast %27 : vector<4x1xf32> to vector<4x8xf32>
    %31 = arith.subf %23, %30 : vector<4x8xf32>
    %32 = math.exp %31 : vector<4x8xf32>
    %33 = arith.mulf %32, %19 : vector<4x8xf32>
    %c0_15 = arith.constant 0 : index
    %c0_16 = arith.constant 0 : index
    %34 = vector.load %arg16[%c0_15, %c0_16] : memref<4x1xf32, #tpu.memory_space<vmem>>, vector<4x1xf32>
    %35 = arith.mulf %29, %34 : vector<4x1xf32>
    %cst_17 = arith.constant dense<0.000000e+00> : vector<4xf32>
    %36 = vector.multi_reduction <add>, %33, %cst_17 [1] : vector<4x8xf32> to vector<4xf32>
    %37 = vector.shape_cast %36 : vector<4xf32> to vector<4x1xf32>
    %38 = arith.addf %35, %37 : vector<4x1xf32>
    %c0_18 = arith.constant 0 : index
    %c0_19 = arith.constant 0 : index
    %39 = vector.load %arg16[%c0_18, %c0_19] : memref<4x1xf32, #tpu.memory_space<vmem>>, vector<4x1xf32>
    tpu.vector_store %arg16[%c0_18, %c0_19], %38 {strides = array<i32>} : memref<4x1xf32, #tpu.memory_space<vmem>>, vector<4x1xf32>,
    %c0_20 = arith.constant 0 : index
    %c0_21 = arith.constant 0 : index
    %40 = vector.load %arg17[%c0_20, %c0_21] : memref<4x1xf32, #tpu.memory_space<vmem>>, vector<4x1xf32>
    tpu.vector_store %arg17[%c0_20, %c0_21], %27 {strides = array<i32>} : memref<4x1xf32, #tpu.memory_space<vmem>>, vector<4x1xf32>,
    %c0_22 = arith.constant 0 : index
    %c0_23 = arith.constant 0 : index
    %41 = vector.load %arg10[%c0_22, %c0_23] : memref<4x8xf32, #tpu.memory_space<vmem>>, vector<4x8xf32>
    tpu.vector_store %arg10[%c0_22, %c0_23], %33 {strides = array<i32>} : memref<4x8xf32, #tpu.memory_space<vmem>>, vector<4x8xf32>,
    %42 = vector.shape_cast %27 : vector<4x1xf32> to vector<4x1xf32>
    %43 = vector.broadcast %42 : vector<4x1xf32> to vector<4x8xf32>
    %c0_24 = arith.constant 0 : index
    %c0_25 = arith.constant 0 : index
    %44 = vector.load %arg11[%c0_24, %c0_25] : memref<4x8xf32, #tpu.memory_space<vmem>>, vector<4x8xf32>
    tpu.vector_store %arg11[%c0_24, %c0_25], %43 {strides = array<i32>} : memref<4x8xf32, #tpu.memory_space<vmem>>, vector<4x8xf32>,
    %c0_26 = arith.constant 0 : index
    %c0_27 = arith.constant 0 : index
    %c0_28 = arith.constant 0 : index
    %45 = vector.load %arg5[%c0_26, %c0_27, %c0_28] : memref<4x8x32xbf16, #tpu.memory_space<vmem>>, vector<4x8x32xbf16>
    %46 = arith.extf %45 : vector<4x8x32xbf16> to vector<4x8x32xf32>
    %47 = vector.shape_cast %33 : vector<4x8xf32> to vector<4x1x8xf32>
    "tpu.trace_start"() <{level = 10 : i32, message = "bqt,bte->bqe"}> : () -> ()
    %cst_29 = arith.constant dense<0.000000e+00> : vector<4x1x32xf32>
    %48 = tpu.matmul %47, %46, %cst_29 {dimension_numbers = #tpu.dot_dimension_numbers<[2], [1], [1], [2], [0, 0, 0, 1, 1, 2], [0], [0]>} : vector<4x1x8xf32>, vector<4x8x32xf32>, vector<4x1x32xf32> -> vector<4x1x32xf32>
    "tpu.trace_stop"() : () -> ()
    %49 = vector.shape_cast %48 : vector<4x1x32xf32> to vector<4x32xf32>
    %c0_30 = arith.constant 0 : index
    %c0_31 = arith.constant 0 : index
    %50 = vector.load %arg15[%c0_30, %c0_31] : memref<4x32xf32, #tpu.memory_space<vmem>>, vector<4x32xf32>
    %51 = vector.broadcast %29 : vector<4x1xf32> to vector<4x32xf32>
    %52 = arith.mulf %51, %50 : vector<4x32xf32>
    %53 = arith.addf %52, %49 : vector<4x32xf32>
    %c0_32 = arith.constant 0 : index
    %c0_33 = arith.constant 0 : index
    %54 = vector.load %arg15[%c0_32, %c0_33] : memref<4x32xf32, #tpu.memory_space<vmem>>, vector<4x32xf32>
    tpu.vector_store %arg15[%c0_32, %c0_33], %53 {strides = array<i32>} : memref<4x32xf32, #tpu.memory_space<vmem>>, vector<4x32xf32>,
    %c0_i32_34 = arith.constant 0 : i32
    %55 = arith.cmpi eq, %arg1, %c0_i32_34 : i32
    %56 = arith.extui %55 : i1 to i32
    %c0_i32_35 = arith.constant 0 : i32
    %57 = arith.cmpi ne, %56, %c0_i32_35 : i32
    scf.if %57 {
      %c0_36 = arith.constant 0 : index
      %c0_37 = arith.constant 0 : index
      %58 = vector.load %arg16[%c0_36, %c0_37] : memref<4x1xf32, #tpu.memory_space<vmem>>, vector<4x1xf32>
      %cst_38 = arith.constant 1.000000e-30 : f32
      %59 = vector.broadcast %cst_38 : f32 to vector<4x1xf32>
      %60 = arith.maximumf %58, %59 : vector<4x1xf32>
      %c0_39 = arith.constant 0 : index
      %c0_40 = arith.constant 0 : index
      %61 = vector.load %arg15[%c0_39, %c0_40] : memref<4x32xf32, #tpu.memory_space<vmem>>, vector<4x32xf32>
      %62 = vector.broadcast %60 : vector<4x1xf32> to vector<4x32xf32>
      %63 = arith.divf %61, %62 : vector<4x32xf32>
      %c0_41 = arith.constant 0 : index
      %c0_42 = arith.constant 0 : index
      %64 = vector.load %arg13[%c0_41, %c0_42] : memref<4x32xf32, #tpu.memory_space<vmem>>, vector<4x32xf32>
      tpu.vector_store %arg13[%c0_41, %c0_42], %63 {strides = array<i32>} : memref<4x32xf32, #tpu.memory_space<vmem>>, vector<4x32xf32>,
      %c0_43 = arith.constant 0 : index
      %c0_44 = arith.constant 0 : index
      %65 = vector.load %arg16[%c0_43, %c0_44] : memref<4x1xf32, #tpu.memory_space<vmem>>, vector<4x1xf32>
      %c0_45 = arith.constant 0 : index
      %c0_46 = arith.constant 0 : index
      %66 = vector.load %arg12[%c0_45, %c0_46] : memref<4x1xf32, #tpu.memory_space<vmem>>, vector<4x1xf32>
      tpu.vector_store %arg12[%c0_45, %c0_46], %65 {strides = array<i32>} : memref<4x1xf32, #tpu.memory_space<vmem>>, vector<4x1xf32>,
    } else {
    }
    return
  }
  func.func @transform_0(%arg0: i32, %arg1: i32) -> i32 {
    %c0_i32 = arith.constant 0 : i32
    %c0_i32_0 = arith.constant 0 : i32
    return %c0_i32 : i32
  }
  func.func @transform_1(%arg0: i32, %arg1: i32) -> (i32, i32) {
    %c0_i32 = arith.constant 0 : i32
    %c0_i32_0 = arith.constant 0 : i32
    return %arg0, %c0_i32 : i32, i32
  }
  func.func @transform_2(%arg0: i32, %arg1: i32) -> (i32, i32, i32) {
    %c0_i32 = arith.constant 0 : i32
    %c0_i32_0 = arith.constant 0 : i32
    return %arg1, %arg0, %c0_i32 : i32, i32, i32
  }
  func.func @transform_3(%arg0: i32, %arg1: i32) -> (i32, i32, i32) {
    %c0_i32 = arith.constant 0 : i32
    %c0_i32_0 = arith.constant 0 : i32
    return %arg0, %arg1, %c0_i32 : i32, i32, i32
  }
  func.func @transform_4(%arg0: i32, %arg1: i32) -> (i32, i32) {
    %c0_i32 = arith.constant 0 : i32
    return %arg0, %arg1 : i32, i32
  }
  func.func @transform_5(%arg0: i32, %arg1: i32) -> (i32, i32) {
    %c0_i32 = arith.constant 0 : i32
    %c0_i32_0 = arith.constant 0 : i32
    %c0_i32_1 = arith.constant 0 : i32
    return %c0_i32, %c0_i32_0 : i32, i32
  }
  func.func @transform_6(%arg0: i32, %arg1: i32) -> (i32, i32) {
    %c0_i32 = arith.constant 0 : i32
    %c0_i32_0 = arith.constant 0 : i32
    %c0_i32_1 = arith.constant 0 : i32
    return %c0_i32, %c0_i32_0 : i32, i32
  }
  func.func @transform_7(%arg0: i32, %arg1: i32) -> (i32, i32) {
    %c0_i32 = arith.constant 0 : i32
    %c0_i32_0 = arith.constant 0 : i32
    %c0_i32_1 = arith.constant 0 : i32
    return %c0_i32, %c0_i32_0 : i32, i32
  }
  func.func @transform_8(%arg0: i32, %arg1: i32) -> (i32, i32) {
    %c0_i32 = arith.constant 0 : i32
    return %arg0, %arg1 : i32, i32
  }
  func.func @transform_9(%arg0: i32, %arg1: i32) -> (i32, i32) {
    %c0_i32 = arith.constant 0 : i32
    return %arg0, %arg1 : i32, i32
  }
  func.func @transform_10(%arg0: i32, %arg1: i32) -> (i32, i32) {
    %c0_i32 = arith.constant 0 : i32
    %c0_i32_0 = arith.constant 0 : i32
    return %arg0, %c0_i32 : i32, i32
  }
  func.func @transform_11(%arg0: i32, %arg1: i32) -> (i32, i32) {
    %c0_i32 = arith.constant 0 : i32
    %c0_i32_0 = arith.constant 0 : i32
    return %arg0, %c0_i32 : i32, i32
  }
}

</mosaic_0001>

<bundles_post_ra>
// kernel: tpu_custom_call.1
= control target key start
LH: loop header
LB: loop body
LE: loop exit
PB: predicated region body
PF: predicated region fallthrough
CT: control target
= control target key end

     0   :  { %18 = vsyncpa [#allocation8], 0  ;;  %s1039_s0 = inlined_call_operand.<no memory space> [shape: f32[1], index: 0, kind: input, shape index: {}]   ;;  %s1040_s1 = inlined_call_operand.hbm [shape: f32[4,32], index: 1, kind: input, shape index: {}]   ;;  %s1041_s2 = inlined_call_operand.hbm [shape: bf16[8,4,32], index: 2, kind: input, shape index: {}]   ;;  %s1042_s3 = inlined_call_operand.hbm [shape: bf16[8,4,32], index: 3, kind: input, shape index: {}]   ;;  %s1043_s4 = inlined_call_operand.vmem [shape: f32[4,8], index: 4, kind: input, shape index: {}]   ;;  %s1044_s5 = inlined_call_operand.hbm [shape: f32[32,32], index: 5, kind: input, shape index: {}]   ;;  %s1045_s6 = inlined_call_operand.vmem [shape: f32[1,32], index: 6, kind: input, shape index: {}]   ;;  %s1046_s7 = inlined_call_operand.vmem [shape: f32[1,32], index: 7, kind: input, shape index: {}]   ;;  %s1047_s8 = inlined_call_operand.hbm [shape: f32[4,8], index: 8, kind: output, shape index: {0}]   ;;  %s1048_s9 = inlined_call_operand.hbm [shape: f32[4,8], index: 9, kind: output, shape index: {1}]   ;;  %s1049_s10 = inlined_call_operand.vmem [shape: f32[4,1], index: 10, kind: output, shape index: {2}]   ;;  %s1050_s11 = inlined_call_operand.hbm [shape: f32[4,32], index: 11, kind: output, shape index: {3}]  }
   0x1   :  { %19 = vsyncpa [#allocation11], 0 }
   0x2   :  { %20 = vsyncpa [#allocation14], 0 }
   0x3   :  { %21 = vsyncpa [#allocation9], 0 }
   0x4   :  { %22 = vsyncpa [#allocation17], 0  ;;  %s818_s17 = smov [#allocation10]   ;;  %s654_s21 = scalar_lea.hbm %s1041_s2, 256 }
   0x5   :  { %s40_s18 = sshll.u32 %s818_s17, 4  ;;  %p655_p0 = scmp.ne.s32.totalorder %s1041_s2, %s654_s21  ;;  %s41_s18 = int_to_ptr.vmem [resolvable:$true] %s40_s18 }
   0x6   :  { %p658_p1 = scmp.lt.u32.totalorder %s654_s21, %s1041_s2 }
   0x8   :  { %p660_p2 = pnand %p658_p1, %p655_p0 }
   0xa   :  { %663 = shalt.err (!%p660_p2)
}
   0xb   :  { %s664_s26 = scalar_lea.vmem %s41_s18, 256  ;;  %p669_p4 = scmp.lt.s32.totalorder %s41_s18, %s41_s18 }
   0xc   :  { %p665_p3 = scmp.ne.s32.totalorder %s41_s18, %s664_s26  ;;  %p670_p5 = scmp.lt.s32.totalorder %s664_s26, %s664_s26 }
   0xe   :  { %p671_p6 = por %p670_p5, %p669_p4 }
  0x10   :  { %p672_p7 = pnand %p671_p6, %p665_p3 }
  0x12   :  { %675 = shalt.err (!%p672_p7)
}
  0x13   :  { %s819_s27 = smov 32   ;;  %s820_s28 = smov 2  }
  0x14   :  { %46 = dma.hbm_to_vmem [thread:$0]  %s1041_s2, 256, %s41_s18, [#allocation11], %s819_s27, %s819_s27, %s820_s28  }
  0x15   :  { %s821_s12 = smov [#allocation7]   ;;  %s822_s14 = smov [#allocation12]  }
  0x16   :  { %s31_s13 = sshll.u32 %s821_s12, 4  ;;  %s52_s15 = sshll.u32 %s822_s14, 4  ;;  %s32_s13 = int_to_ptr.vmem [resolvable:$true] %s31_s13  ;;  %s53_s15 = int_to_ptr.vmem [resolvable:$true] %s52_s15 }
  0x17   :  { %s676_s19 = scalar_lea.hbm %s1040_s1, 64 }
  0x18   :  { %p677_p8 = scmp.ne.s32.totalorder %s1040_s1, %s676_s19  ;;  %p680_p9 = scmp.lt.u32.totalorder %s676_s19, %s1040_s1 }
  0x1a   :  { %p682_p10 = pnand %p680_p9, %p677_p8 }
  0x1c   :  { %685 = shalt.err (!%p682_p10)
}
  0x1d   :  { %s686_s2 = scalar_lea.vmem %s32_s13, 64  ;;  %p691_p12 = scmp.lt.s32.totalorder %s32_s13, %s32_s13 }
  0x1e   :  { %p687_p11 = scmp.ne.s32.totalorder %s32_s13, %s686_s2  ;;  %p692_p13 = scmp.lt.s32.totalorder %s686_s2, %s686_s2 }
  0x20   :  { %p693_p0 = por %p692_p13, %p691_p12 }
  0x22   :  { %p694_p1 = pnand %p693_p0, %p687_p11 }
  0x24   :  { %697 = shalt.err (!%p694_p1)
}
  0x25   :  { %34 = dma.hbm_to_vmem [thread:$0]  %s1040_s1, 64, %s32_s13, [#allocation8]  }
  0x26   :  { %s698_s29 = scalar_lea.hbm %s1042_s3, 256 }
  0x27   :  { %p699_p2 = scmp.ne.s32.totalorder %s1042_s3, %s698_s29  ;;  %p702_p3 = scmp.lt.u32.totalorder %s698_s29, %s1042_s3 }
  0x29   :  { %p704_p4 = pnand %p702_p3, %p699_p2 }
  0x2b   :  { %707 = shalt.err (!%p704_p4)
}
  0x2c   :  { %s708_s17 = scalar_lea.vmem %s53_s15, 256  ;;  %p713_p6 = scmp.lt.s32.totalorder %s53_s15, %s53_s15 }
  0x2d   :  { %p709_p5 = scmp.ne.s32.totalorder %s53_s15, %s708_s17  ;;  %p714_p7 = scmp.lt.s32.totalorder %s708_s17, %s708_s17 }
  0x2f   :  { %p715_p8 = por %p714_p7, %p713_p6 }
  0x31   :  { %p716_p9 = pnand %p715_p8, %p709_p5 }
  0x33   :  { %719 = shalt.err (!%p716_p9)
}
  0x34   :  { %58 = dma.hbm_to_vmem [thread:$0]  %s1042_s3, 256, %s53_s15, [#allocation11], %s819_s27, %s819_s27, %s820_s28  }
  0x35   :  { %s823_s19 = smov [#allocation13]   ;;  %s720_s23 = scalar_lea.hbm %s1044_s5, 512 }
  0x36   :  { %s66_s20 = sshll.u32 %s823_s19, 4  ;;  %p721_p10 = scmp.ne.s32.totalorder %s1044_s5, %s720_s23  ;;  %s67_s20 = int_to_ptr.vmem [resolvable:$true] %s66_s20 }
  0x37   :  { %p724_p11 = scmp.lt.u32.totalorder %s720_s23, %s1044_s5 }
  0x39   :  { %p726_p12 = pnand %p724_p11, %p721_p10 }
  0x3b   :  { %729 = shalt.err (!%p726_p12)
}
  0x3c   :  { %s730_s26 = scalar_lea.vmem %s67_s20, 512  ;;  %p735_p0 = scmp.lt.s32.totalorder %s67_s20, %s67_s20 }
  0x3d   :  { %p731_p13 = scmp.ne.s32.totalorder %s67_s20, %s730_s26  ;;  %p736_p1 = scmp.lt.s32.totalorder %s730_s26, %s730_s26 }
  0x3f   :  { %p737_p2 = por %p736_p1, %p735_p0 }
  0x41   :  { %p738_p3 = pnand %p737_p2, %p731_p13 }
  0x43   :  { %741 = shalt.err (!%p738_p3)
}
  0x44   :  { %s824_s3 = smov 128   ;;  %s825_s27 = smov 8  }
  0x45   :  { %72 = dma.hbm_to_vmem [thread:$0]  %s1044_s5, 512, %s67_s20, [#allocation14], %s824_s3, %s824_s3, %s825_s27  }
  0x46   :  { %808 = dma.done.wait [#allocation8], 64  }
  0x47   :  { %809 = vsyncadd [#allocation8], 4294967232 }
  0x48   :  { %810 = dma.done.wait [#allocation11], 512  }
  0x49   :  { %811 = vsyncadd [#allocation11], 4294966784 }
  0x4a   :  { %812 = dma.done.wait [#allocation14], 512  }
  0x4b   :  { %813 = vsyncadd [#allocation14], 4294966784  ;;  %vm179_vm0 = vcmask 257024   ;;  %v826_v0 = vmov 0.0|0.0   ;;  %vm827_vm1 = vmmov 0   ;;  %v828_v1 = vmov 0.0  }
  0x4c   :  { %608 = vmatprep.subr.bf16.mxu0 %v826_v0  ;;  %605 = vmatprep.mubr.msk.f32.mxu0 %vm827_vm1, %v828_v1  ;;  %181 = vst.msk [vmem:[#allocation3] sm:$0xf] %vm179_vm0, %v828_v1  ;;  %vm182_vm2 = vcmask 3072   ;;  %v94_v2 = vld [vmem:[#allocation13] sm:$0xff]  ;;  %v95_v3 = vld [vmem:[#allocation13 + $0x8] sm:$0xff]  ;;  %v96_v4 = vld [vmem:[#allocation13 + $0x10] sm:$0xff]  ;;  %v276_v63 = vlaneseq }
  0x4d   :  { %183 = vst.msk [vmem:[#allocation4] sm:$0xf] %vm182_vm2, %v828_v1  ;;  %v609_v5 = vpack.c.bf16 %v95_v3, %v94_v2  ;;  %v97_v6 = vld [vmem:[#allocation13 + $0x18] sm:$0xff]  ;;  %vm105_vm3 = vcmask 261120   ;;  %v589_v9 = vld [vmem:[%s1045_s6] ss:$0 sm:$0xff]  ;;  %v259_v3 = vstv %s1039_s0 }
  0x4e   :  { %v612_v7 = vpack.c.bf16 %v97_v6, %v96_v4  ;;  %v93_v8 = vld [vmem:[#allocation7] sm:$0xf]  ;;  %v187_v13 = vld [vmem:[#allocation10 + $0x4] sm:$0x3]  ;;  %v185_v14 = vld [vmem:[#allocation10] sm:$0x3] }
  0x4f   :  { %610 = vmatpush3.bf16.msra.mxu0 %v609_v5  ;;  %v188_v15 = vld [vmem:[#allocation10 + $0x6] sm:$0x3]  ;;  %v186_v16 = vld [vmem:[#allocation10 + $0x2] sm:$0x3]  ;;  %v190_v17 = vld [vmem:[#allocation10 + $0xa] sm:$0x3]  ;;  %v195_v18 = vunpack.c.l.bf16 %v187_v13  ;;  %v193_v19 = vunpack.c.l.bf16 %v185_v14 }
  0x50   :  { %611 = vmatprep.subr.bf16.mxu0 %v826_v0  ;;  %v196_v20 = vunpack.c.l.bf16 %v188_v15  ;;  %v189_v21 = vld [vmem:[#allocation10 + $0x8] sm:$0x3]  ;;  %v194_v22 = vunpack.c.l.bf16 %v186_v16  ;;  %v198_v23 = vunpack.c.l.bf16 %v190_v17  ;;  %v192_v26 = vld [vmem:[#allocation10 + $0xe] sm:$0x3]  ;;  %v191_v30 = vld [vmem:[#allocation10 + $0xc] sm:$0x3] }
  0x51   :  { %v197_v25 = vunpack.c.l.bf16 %v189_v21  ;;  %v200_v33 = vunpack.c.l.bf16 %v192_v26  ;;  %v199_v35 = vunpack.c.l.bf16 %v191_v30  ;;  %v591_v38 = vld [vmem:[%s1046_s7] ss:$0 sm:$0xff]  ;;  %v277_v0 = vand.u32 127, %v276_v63  ;;  %s831_s17 = smov [#allocation16]   ;;  %s832_s13 = smov [#allocation15]  }
  0x52   :  { %v965_v1 = vshrl.u32 %v276_v63, 7  ;;  %vm310_vm4 = vcmask 1041409   ;;  %vm312_vm5 = vcmask 1042434   ;;  %vm314_vm6 = vcmask 1043459   ;;  %s557_s1 = sshll.u32 %s831_s17, 4  ;;  %s547_s19 = sshll.u32 %s832_s13, 4  ;;  %s558_s1 = int_to_ptr.vmem [resolvable:$true] %s557_s1  ;;  %s548_s19 = int_to_ptr.vmem [resolvable:$true] %s547_s19 }
  0x53   :  { %613 = vmatpush3.bf16.msra.mxu0 %v612_v7  ;;  %vm316_vm7 = vcmask 1044484   ;;  %vm318_vm8 = vcmask 1045509   ;;  %vm320_vm9 = vcmask 1046534   ;;  %vm322_vm10 = vcmask 1047559   ;;  %s742_s20 = scalar_lea.vmem %s558_s1, 64  ;;  %p747_p5 = scmp.lt.s32.totalorder %s558_s1, %s558_s1 }
  0x54   :  { %v280_v5 = vsub.s32 %v277_v0, %v965_v1  ;;  %vm361_vm12 = vcmask 60416   ;;  %v467_v0 = vsub.s32 4, %v965_v1  ;;  %p743_p4 = scmp.ne.s32.totalorder %s558_s1, %s742_s20  ;;  %p748_p6 = scmp.lt.s32.totalorder %s742_s20, %s742_s20 }
  0x56   :  { %606 = vmatmul.mubr.msk.f32.vlgmr.msra.gmra.mrb[0].mxu0 %vm105_vm3, %v93_v8  ;;  %p749_p7 = por %p748_p6, %p747_p5 }
  0x58   :  { %p750_p8 = pnand %p749_p7, %p743_p4 }
 0x129   :  { %v175_v10 = vpop.f32.mrb[0].mxu0 }
 0x12a   :  { %v176_v11 = vadd.f32 %v589_v9, %v175_v10  ;;  %v607_v12 = vpop.f32.mrb[1].mxu0 }
 0x12c   :  { %180 = vst.msk [vmem:[#allocation2] sm:$0xf] %vm179_vm0, %v176_v11 }
 0x133   :  { %v201_v24 = vld [vmem:[#allocation2] sm:$0xf] }
 0x134   :  { %v204_v27 = vadd.f32 %v201_v24, %v195_v18  ;;  %v202_v28 = vadd.f32 %v201_v24, %v193_v19  ;;  %v205_v29 = vadd.f32 %v201_v24, %v196_v20  ;;  %v203_v31 = vadd.f32 %v201_v24, %v194_v22 }
 0x135   :  { %v207_v32 = vadd.f32 %v201_v24, %v198_v23  ;;  %v206_v34 = vadd.f32 %v201_v24, %v197_v25  ;;  %v209_v36 = vadd.f32 %v201_v24, %v200_v33  ;;  %v208_v37 = vadd.f32 %v201_v24, %v199_v35 }
 0x136   :  { %632 = vtanh.f32 %v204_v27  ;;  %v829_v35 = vmov -1e+30  }
 0x137   :  { %634 = vtanh.f32 %v202_v28  ;;  %184 = vst.msk [vmem:[#allocation5] sm:$0xf] %vm182_vm2, %v829_v35 }
 0x138   :  { %636 = vtanh.f32 %v205_v29 }
 0x139   :  { %638 = vtanh.f32 %v203_v31 }
 0x13a   :  { %640 = vtanh.f32 %v207_v32 }
 0x13b   :  { %642 = vtanh.f32 %v206_v34 }
 0x13c   :  { %644 = vtanh.f32 %v209_v36  ;;  %v357_v36 = vld [vmem:[%s1043_s4] sm:$0xf] }
 0x13d   :  { %646 = vtanh.f32 %v208_v37  ;;  %vm358_vm11 = vcmp.gt.f32.partialorder %v357_v36, 0.0 }
 0x140   :  { %v633_v39 = vpop.eup %632 }
 0x141   :  { %v635_v40 = vpop.eup %634  ;;  %v227_v41 = vmul.f32 %v633_v39, %v591_v38 }
 0x142   :  { %v637_v42 = vpop.eup %636  ;;  %v225_v43 = vmul.f32 %v635_v40, %v591_v38  ;;  %v830_v40 = vmov 0  }
 0x143   :  { %v639_v44 = vpop.eup %638  ;;  %v240_v45 = vsel %vm179_vm0, %v227_v41, 0.0  ;;  %v228_v46 = vmul.f32 %v637_v42, %v591_v38  ;;  %630 = vset.pattern.permute.xlu1 %v830_v40  ;;  %v360_v41 = vld [vmem:[#allocation5] sm:$0xf] }
 0x144   :  { %v641_v47 = vpop.eup %640  ;;  %241 = vadd.xlane.f32.xlu1 %v240_v45  ;;  %v234_v48 = vsel %vm179_vm0, %v225_v43, 0.0  ;;  %v226_v49 = vmul.f32 %v639_v44, %v591_v38 }
 0x145   :  { %v643_v50 = vpop.eup %642  ;;  %235 = vadd.xlane.f32.xlu0 %v234_v48  ;;  %v243_v51 = vsel %vm179_vm0, %v228_v46, 0.0  ;;  %v230_v52 = vmul.f32 %v641_v47, %v591_v38 }
 0x146   :  { %v645_v53 = vpop.eup %644  ;;  %v237_v54 = vsel %vm179_vm0, %v226_v49, 0.0  ;;  %v229_v55 = vmul.f32 %v643_v50, %v591_v38 }
 0x147   :  { %v647_v56 = vpop.eup %646  ;;  %v249_v57 = vsel %vm179_vm0, %v230_v52, 0.0  ;;  %v232_v58 = vmul.f32 %v645_v53, %v591_v38  ;;  %v439_v52 = vsub.s32 0, %v965_v1  ;;  %v446_v53 = vsub.s32 1, %v965_v1 }
 0x148   :  { %244 = vadd.xlane.f32.xlu1 %v243_v51  ;;  %v246_v59 = vsel %vm179_vm0, %v229_v55, 0.0  ;;  %v231_v60 = vmul.f32 %v647_v56, %v591_v38 }
 0x149   :  { %238 = vadd.xlane.f32.xlu0 %v237_v54  ;;  %v255_v61 = vsel %vm179_vm0, %v232_v58, 0.0  ;;  %v453_v54 = vsub.s32 2, %v965_v1 }
 0x14a   :  { %v252_v62 = vsel %vm179_vm0, %v231_v60, 0.0  ;;  %v488_v60 = vsub.s32 7, %v965_v1 }
 0x14c   :  { %250 = vadd.xlane.f32.xlu1 %v249_v57 }
 0x14d   :  { %247 = vadd.xlane.f32.xlu0 %v246_v59  ;;  %v460_v59 = vsub.s32 3, %v965_v1 }
 0x150   :  { %256 = vadd.xlane.f32.xlu1 %v255_v61 }
 0x151   :  { %253 = vadd.xlane.f32.xlu0 %v252_v62 }
 0x1d1   :  { %v242_v2 = vpop.xlane.xlu1 %241 }
 0x1d2   :  { %v236_v4 = vpop.xlane.xlu0 %235  ;;  %v262_v8 = vadd.f32 %v259_v3, %v242_v2  ;;  %v378_v2 = vld [vmem:[#allocation4] sm:$0xf] }
 0x1d3   :  { %v260_v6 = vadd.f32 %v259_v3, %v236_v4 }
 0x1d4   :  { %v289_v15 = vrot.slane %v262_v8, %v280_v5 }
 0x1d5   :  { %v245_v7 = vpop.xlane.xlu1 %244  ;;  %v281_v12 = vrot.slane %v260_v6, %v280_v5 }
 0x1d6   :  { %v239_v9 = vpop.xlane.xlu0 %238  ;;  %v263_v10 = vadd.f32 %v259_v3, %v245_v7 }
 0x1d7   :  { %v261_v11 = vadd.f32 %v259_v3, %v239_v9 }
 0x1d8   :  { %v293_v18 = vrot.slane %v263_v10, %v280_v5 }
 0x1d9   :  { %v285_v13 = vrot.slane %v261_v11, %v280_v5  ;;  %v251_v14 = vpop.xlane.xlu1 %250 }
 0x1da   :  { %v265_v16 = vadd.f32 %v259_v3, %v251_v14  ;;  %v248_v17 = vpop.xlane.xlu0 %247 }
 0x1db   :  { %v311_v19 = vsel %vm310_vm4, %v285_v13, %v281_v12  ;;  %v264_v20 = vadd.f32 %v259_v3, %v248_v17  ;;  %v481_v12 = vsub.s32 6, %v965_v1 }
 0x1dc   :  { %v313_v21 = vsel %vm312_vm5, %v289_v15, %v311_v19  ;;  %v301_v25 = vrot.slane %v265_v16, %v280_v5 }
 0x1dd   :  { %v315_v22 = vsel %vm314_vm6, %v293_v18, %v313_v21  ;;  %v297_v23 = vrot.slane %v264_v20, %v280_v5  ;;  %v257_v24 = vpop.xlane.xlu1 %256 }
 0x1de   :  { %v267_v26 = vadd.f32 %v259_v3, %v257_v24  ;;  %v254_v27 = vpop.xlane.xlu0 %253 }
 0x1df   :  { %v317_v28 = vsel %vm316_vm7, %v297_v23, %v315_v22  ;;  %v266_v29 = vadd.f32 %v259_v3, %v254_v27 }
 0x1e0   :  { %v309_v30 = vrot.slane %v267_v26, %v280_v5  ;;  %v319_v32 = vsel %vm318_vm8, %v301_v25, %v317_v28 }
 0x1e1   :  { %v305_v31 = vrot.slane %v266_v29, %v280_v5  ;;  %v474_v5 = vsub.s32 5, %v965_v1 }
 0x1e3   :  { %v321_v33 = vsel %vm320_vm9, %v305_v31, %v319_v32 }
 0x1e4   :  { %v323_v34 = vsel %vm322_vm10, %v309_v30, %v321_v33 }
 0x1e5   :  { %325 = vxpose.xlu0.b32.start.end [1/1] (short) (narrow) %v323_v34, 8 }
 0x265   :  { %v341_v37 = vpop.trf.xlu0 }
 0x266   :  { %v359_v38 = vsel %vm358_vm11, %v341_v37, -1e+30 }
 0x267   :  { %v362_v39 = vsel %vm361_vm12, %v359_v38, -inf }
 0x268   :  { %363 = vmax.xlane.f32.xlu1 %v362_v39 }
 0x2f5   :  { %v364_v42 = vpop.xlane.xlu1 %363 }
 0x2f6   :  { %v365_v43 = vmax.f32 %v360_v41, %v364_v42 }
 0x2f8   :  { %v366_v44 = vsub.f32 %v360_v41, %v365_v43  ;;  %386 = vst.msk [vmem:[#allocation5] sm:$0xf] %vm182_vm2, %v365_v43  ;;  %371 = vperm.xlu1 %630, %v365_v43  }
 0x2fa   :  { %v367_v51 = vmul.f32 1.442695, %v366_v44 }
 0x377   :  { %v372_v45 = vpop.permute.xlu1 %371 }
 0x378   :  { %v374_v46 = vsub.f32 %v359_v38, %v372_v45  ;;  %388 = vst.msk [vmem:[#allocation16] sm:$0xf] %vm361_vm12, %v372_v45 }
 0x37a   :  { %v375_v47 = vmul.f32 1.442695, %v374_v46 }
 0x37c   :  { %648 = vpow2.f32 %v375_v47 }
 0x37d   :  { %650 = vpow2.f32 %v367_v51 }
 0x386   :  { %v649_v48 = vpop.eup %648 }
 0x387   :  { %v377_v49 = vmul.f32 %v649_v48, %v357_v36  ;;  %v651_v61 = vpop.eup %650 }
 0x388   :  { %v379_v3 = vmul.f32 %v651_v61, %v378_v2 }
 0x389   :  { %405 = vxpose.xlu0.b32.start.end [1/1] (short) (narrow) %v377_v49, 8  ;;  %387 = vst.msk [vmem:[#allocation15] sm:$0xf] %vm361_vm12, %v377_v49  ;;  %v380_v50 = vsel %vm361_vm12, %v377_v49, 0.0 }
 0x38a   :  { %381 = vadd.xlane.f32.xlu1 %v380_v50 }
 0x3b2   :  { %631 = vset.pattern.permute.xlu0 %v830_v40 }
 0x409   :  { %v421_v55 = vpop.trf.xlu0 }
 0x40a   :  { %v440_v56 = vrot.slane %v421_v55, %v439_v52  ;;  %v447_v57 = vrot.slane %v421_v55, %v446_v53  ;;  %v454_v58 = vrot.slane %v421_v55, %v453_v54  ;;  %v461_v62 = vrot.slane %v421_v55, %v460_v59 }
 0x40b   :  { %v489_v63 = vrot.slane %v421_v55, %v488_v60  ;;  %v468_v4 = vrot.slane %v421_v55, %v467_v0  ;;  %v475_v8 = vrot.slane %v421_v55, %v474_v5  ;;  %v482_v13 = vrot.slane %v421_v55, %v481_v12 }
 0x40c   :  { %442 = vbcast.lane.b32.xlu0 %v440_v56, 256  ;;  %449 = vbcast.lane.b32.xlu1 %v447_v57, 256 }
 0x410   :  { %456 = vbcast.lane.b32.xlu1 %v454_v58, 256  ;;  %519 = vperm.xlu0 %631, %v651_v61  }
 0x414   :  { %463 = vbcast.lane.b32.xlu1 %v461_v62, 256  ;;  %491 = vbcast.lane.b32.xlu0 %v489_v63, 256 }
 0x417   :  { %v382_v6 = vpop.xlane.xlu1 %381 }
 0x418   :  { %v383_v7 = vadd.f32 %v382_v6, %v379_v3  ;;  %470 = vbcast.lane.b32.xlu1 %v468_v4, 256 }
 0x41a   :  { %385 = vst.msk [vmem:[#allocation4] sm:$0xf] %vm182_vm2, %v383_v7 }
 0x41c   :  { %477 = vbcast.lane.b32.xlu1 %v475_v8, 256 }
 0x421   :  { %v539_v9 = vld [vmem:[#allocation4] sm:$0xf] }
 0x422   :  { %v528_v10 = vld [vmem:[#allocation4] sm:$0xf]  ;;  %540 = vst.msk [vmem:[%s1049_s10] sm:$0xf] %vm182_vm2, %v539_v9 }
 0x423   :  { %v529_v11 = vmax.f32 %v528_v10, 1e-30 }
 0x425   :  { %533 = vperm.xlu1 %630, %v529_v11  }
 0x429   :  { %484 = vbcast.lane.b32.xlu1 %v482_v13, 256 }
 0x42a   :  { %753 = shalt.err (!%p750_p8)
}
 0x42b   :  { %s754_s22 = scalar_lea.hbm %s1048_s9, 64 }
 0x42c   :  { %p755_p9 = scmp.ne.s32.totalorder %s1048_s9, %s754_s22  ;;  %p758_p10 = scmp.lt.u32.totalorder %s754_s22, %s1048_s9 }
 0x42e   :  { %p760_p11 = pnand %p758_p10, %p755_p9 }
 0x430   :  { %763 = shalt.err (!%p760_p11)
}
 0x431   :  { %560 = dma.vmem_to_hbm [thread:$0]  %s558_s1, 64, %s1048_s9, [#allocation17]  }
 0x432   :  { %s764_s3 = scalar_lea.vmem %s548_s19, 64  ;;  %p769_p13 = scmp.lt.s32.totalorder %s548_s19, %s548_s19 }
 0x433   :  { %p765_p12 = scmp.ne.s32.totalorder %s548_s19, %s764_s3  ;;  %p770_p0 = scmp.lt.s32.totalorder %s764_s3, %s764_s3 }
 0x435   :  { %p771_p1 = por %p770_p0, %p769_p13 }
 0x437   :  { %p772_p2 = pnand %p771_p1, %p765_p12 }
 0x439   :  { %775 = shalt.err (!%p772_p2)
}
 0x43a   :  { %s776_s15 = scalar_lea.hbm %s1047_s8, 64 }
 0x43b   :  { %p777_p3 = scmp.ne.s32.totalorder %s1047_s8, %s776_s15  ;;  %p780_p4 = scmp.lt.u32.totalorder %s776_s15, %s1047_s8 }
 0x43d   :  { %p782_p5 = pnand %p780_p4, %p777_p3 }
 0x43f   :  { %785 = shalt.err (!%p782_p5)
}
 0x440   :  { %550 = dma.vmem_to_hbm [thread:$0]  %s548_s19, 64, %s1047_s8, [#allocation9]   ;;  %v390_v15 = vld [vmem:[#allocation12 + $0x2] sm:$0x3]  ;;  %v389_v16 = vld [vmem:[#allocation12] sm:$0x3] }
 0x441   :  { %v398_v18 = vunpack.c.l.bf16 %v390_v15  ;;  %v397_v19 = vunpack.c.l.bf16 %v389_v16  ;;  %v391_v21 = vld [vmem:[#allocation12 + $0x4] sm:$0x3]  ;;  %v392_v22 = vld [vmem:[#allocation12 + $0x6] sm:$0x3]  ;;  %v393_v26 = vld [vmem:[#allocation12 + $0x8] sm:$0x3] }
 0x442   :  { %v399_v25 = vunpack.c.l.bf16 %v391_v21  ;;  %v400_v28 = vunpack.c.l.bf16 %v392_v22  ;;  %v394_v29 = vld [vmem:[#allocation12 + $0xa] sm:$0x3]  ;;  %v401_v33 = vunpack.c.l.bf16 %v393_v26  ;;  %v396_v41 = vld [vmem:[#allocation12 + $0xe] sm:$0x3]  ;;  %v395_v42 = vld [vmem:[#allocation12 + $0xc] sm:$0x3] }
 0x443   :  { %v402_v35 = vunpack.c.l.bf16 %v394_v29  ;;  %v404_v48 = vunpack.c.l.bf16 %v396_v41  ;;  %v403_v49 = vunpack.c.l.bf16 %v395_v42  ;;  %v516_v58 = vld [vmem:[#allocation3] sm:$0xf]  ;;  %s833_s8 = smov [#allocation18]  }
 0x444   :  { %s569_s12 = sshll.u32 %s833_s8, 4  ;;  %s570_s12 = int_to_ptr.vmem [resolvable:$true] %s569_s12 }
 0x445   :  { %s786_s0 = scalar_lea.vmem %s570_s12, 64  ;;  %p791_p7 = scmp.lt.s32.totalorder %s570_s12, %s570_s12 }
 0x446   :  { %p787_p6 = scmp.ne.s32.totalorder %s570_s12, %s786_s0  ;;  %p792_p8 = scmp.lt.s32.totalorder %s786_s0, %s786_s0 }
 0x448   :  { %p793_p9 = por %p792_p8, %p791_p7 }
 0x44a   :  { %p794_p10 = pnand %p793_p9, %p787_p6 }
 0x47e   :  { %v450_v1 = vpop.permute.xlu1 %449  ;;  %v443_v20 = vpop.permute.xlu0 %442 }
 0x47f   :  { %v494_v23 = vmul.f32 %v450_v1, %v398_v18  ;;  %v493_v24 = vmul.f32 %v443_v20, %v397_v19 }
 0x481   :  { %v502_v30 = vsel %vm179_vm0, %v494_v23, 0.0  ;;  %v501_v31 = vsel %vm179_vm0, %v493_v24, 0.0 }
 0x482   :  { %v457_v14 = vpop.permute.xlu1 %456  ;;  %v503_v36 = vadd.f32 %v502_v30, %v501_v31 }
 0x483   :  { %v495_v32 = vmul.f32 %v457_v14, %v399_v25 }
 0x485   :  { %v504_v39 = vsel %vm179_vm0, %v495_v32, 0.0 }
 0x486   :  { %v464_v17 = vpop.permute.xlu1 %463  ;;  %v505_v45 = vadd.f32 %v504_v39, %v503_v36 }
 0x487   :  { %v496_v34 = vmul.f32 %v464_v17, %v400_v28 }
 0x489   :  { %v506_v43 = vsel %vm179_vm0, %v496_v34, 0.0 }
 0x48a   :  { %v471_v27 = vpop.permute.xlu1 %470  ;;  %v507_v50 = vadd.f32 %v506_v43, %v505_v45 }
 0x48b   :  { %v497_v40 = vmul.f32 %v471_v27, %v401_v33 }
 0x48d   :  { %v508_v47 = vsel %vm179_vm0, %v497_v40, 0.0 }
 0x48e   :  { %v478_v37 = vpop.permute.xlu1 %477  ;;  %v509_v53 = vadd.f32 %v508_v47, %v507_v50 }
 0x48f   :  { %v520_v38 = vpop.permute.xlu0 %519  ;;  %v498_v44 = vmul.f32 %v478_v37, %v402_v35 }
 0x490   :  { %v522_v62 = vmul.f32 %v520_v38, %v516_v58 }
 0x491   :  { %v510_v52 = vsel %vm179_vm0, %v498_v44, 0.0 }
 0x492   :  { %v511_v57 = vadd.f32 %v510_v52, %v509_v53 }
 0x493   :  { %v492_v51 = vpop.permute.xlu0 %491 }
 0x494   :  { %v500_v55 = vmul.f32 %v492_v51, %v404_v48 }
 0x496   :  { %v514_v61 = vsel %vm179_vm0, %v500_v55, 0.0 }
 0x4a4   :  { %v534_v46 = vpop.permute.xlu1 %533 }
 0x4a5   :  { %652 = vrcp.f32 %v534_v46 }
 0x4a8   :  { %v485_v54 = vpop.permute.xlu1 %484 }
 0x4a9   :  { %v499_v56 = vmul.f32 %v485_v54, %v403_v49 }
 0x4ab   :  { %v512_v59 = vsel %vm179_vm0, %v499_v56, 0.0 }
 0x4ac   :  { %v513_v60 = vadd.f32 %v512_v59, %v511_v57 }
 0x4ae   :  { %v515_v63 = vadd.f32 %v514_v61, %v513_v60 }
 0x4af   :  { %v653_v2 = vpop.eup %652 }
 0x4b0   :  { %v523_v0 = vadd.f32 %v522_v62, %v515_v63 }
 0x4b2   :  { %524 = vst.msk [vmem:[#allocation3] sm:$0xf] %vm179_vm0, %v523_v0 }
 0x4b9   :  { %v530_v3 = vld [vmem:[#allocation3] sm:$0xf] }
 0x4ba   :  { %v537_v4 = vmul.f32 %v653_v2, %v530_v3 }
 0x4bc   :  { %538 = vst.msk [vmem:[#allocation18] sm:$0xf] %vm179_vm0, %v537_v4 }
 0x4bd   :  { %797 = shalt.err (!%p794_p10)
}
 0x4be   :  { %s798_s16 = scalar_lea.hbm %s1050_s11, 64 }
 0x4bf   :  { %p799_p11 = scmp.ne.s32.totalorder %s1050_s11, %s798_s16  ;;  %p802_p12 = scmp.lt.u32.totalorder %s798_s16, %s1050_s11 }
 0x4c1   :  { %p804_p13 = pnand %p802_p12, %p799_p11 }
 0x4c3   :  { %807 = shalt.err (!%p804_p13)
}
 0x4c4   :  { %572 = dma.vmem_to_hbm [thread:$0]  %s570_s12, 64, %s1050_s11, [#allocation17]  }
 0x4c5   :  { %814 = dma.done.wait [#allocation9], 64  }
 0x4c6   :  { %815 = vsyncadd [#allocation9], 4294967232 }
 0x4c7   :  { %816 = dma.done.wait [#allocation17], 128  }
 0x4c8   :  { %817 = vsyncadd [#allocation17], 4294967168 }
 0x4c9   :  { %584 = vsyncpa [#allocation8], 1 }
 0x4ca   :  { %585 = vsyncpa [#allocation11], 1 }
 0x4cb   :  { %586 = vsyncpa [#allocation14], 1 }
 0x4cc   :  { %587 = vsyncpa [#allocation9], 1 }
 0x4cd   :  { %588 = vsyncpa [#allocation17], 1 }

// kernel: tpu_custom_call.1
= control target key start
LH: loop header
LB: loop body
LE: loop exit
PB: predicated region body
PF: predicated region fallthrough
CT: control target
= control target key end

     0   :  { %18 = vsyncpa [#allocation8], 0  ;;  %s1293_s0 = inlined_call_operand.<no memory space> [shape: f32[1], index: 0, kind: input, shape index: {}]   ;;  %s1294_s1 = inlined_call_operand.hbm [shape: f32[4,32], index: 1, kind: input, shape index: {}]   ;;  %s1295_s2 = inlined_call_operand.hbm [shape: bf16[8,4,32], index: 2, kind: input, shape index: {}]   ;;  %s1296_s3 = inlined_call_operand.hbm [shape: bf16[4,8,32], index: 3, kind: input, shape index: {}]   ;;  %s1297_s4 = inlined_call_operand.vmem [shape: f32[4,8], index: 4, kind: input, shape index: {}]   ;;  %s1298_s5 = inlined_call_operand.hbm [shape: f32[32,32], index: 5, kind: input, shape index: {}]   ;;  %s1299_s6 = inlined_call_operand.vmem [shape: f32[1,32], index: 6, kind: input, shape index: {}]   ;;  %s1300_s7 = inlined_call_operand.vmem [shape: f32[1,32], index: 7, kind: input, shape index: {}]   ;;  %s1301_s8 = inlined_call_operand.hbm [shape: f32[4,8], index: 8, kind: output, shape index: {0}]   ;;  %s1302_s9 = inlined_call_operand.hbm [shape: f32[4,8], index: 9, kind: output, shape index: {1}]   ;;  %s1303_s10 = inlined_call_operand.vmem [shape: f32[4,1], index: 10, kind: output, shape index: {2}]   ;;  %s1304_s11 = inlined_call_operand.hbm [shape: f32[4,32], index: 11, kind: output, shape index: {3}]  }
   0x1   :  { %19 = vsyncpa [#allocation11], 0 }
   0x2   :  { %20 = vsyncpa [#allocation14], 0 }
   0x3   :  { %21 = vsyncpa [#allocation9], 0 }
   0x4   :  { %22 = vsyncpa [#allocation17], 0  ;;  %s1068_s17 = smov [#allocation10]   ;;  %s904_s21 = scalar_lea.hbm %s1295_s2, 256 }
   0x5   :  { %s40_s18 = sshll.u32 %s1068_s17, 4  ;;  %p905_p0 = scmp.ne.s32.totalorder %s1295_s2, %s904_s21  ;;  %s41_s18 = int_to_ptr.vmem [resolvable:$true] %s40_s18 }
   0x6   :  { %p908_p1 = scmp.lt.u32.totalorder %s904_s21, %s1295_s2 }
   0x8   :  { %p910_p2 = pnand %p908_p1, %p905_p0 }
   0xa   :  { %913 = shalt.err (!%p910_p2)
}
   0xb   :  { %s914_s26 = scalar_lea.vmem %s41_s18, 256  ;;  %p919_p4 = scmp.lt.s32.totalorder %s41_s18, %s41_s18 }
   0xc   :  { %p915_p3 = scmp.ne.s32.totalorder %s41_s18, %s914_s26  ;;  %p920_p5 = scmp.lt.s32.totalorder %s914_s26, %s914_s26 }
   0xe   :  { %p921_p6 = por %p920_p5, %p919_p4 }
  0x10   :  { %p922_p7 = pnand %p921_p6, %p915_p3 }
  0x12   :  { %925 = shalt.err (!%p922_p7)
}
  0x13   :  { %s1069_s27 = smov 32   ;;  %s1070_s28 = smov 2  }
  0x14   :  { %46 = dma.hbm_to_vmem [thread:$0]  %s1295_s2, 256, %s41_s18, [#allocation11], %s1069_s27, %s1069_s27, %s1070_s28  }
  0x15   :  { %s1071_s12 = smov [#allocation7]   ;;  %s1072_s14 = smov [#allocation12]  }
  0x16   :  { %s31_s13 = sshll.u32 %s1071_s12, 4  ;;  %s52_s15 = sshll.u32 %s1072_s14, 4  ;;  %s32_s13 = int_to_ptr.vmem [resolvable:$true] %s31_s13  ;;  %s53_s15 = int_to_ptr.vmem [resolvable:$true] %s52_s15 }
  0x17   :  { %s926_s19 = scalar_lea.hbm %s1294_s1, 64 }
  0x18   :  { %p927_p8 = scmp.ne.s32.totalorder %s1294_s1, %s926_s19  ;;  %p930_p9 = scmp.lt.u32.totalorder %s926_s19, %s1294_s1 }
  0x1a   :  { %p932_p10 = pnand %p930_p9, %p927_p8 }
  0x1c   :  { %935 = shalt.err (!%p932_p10)
}
  0x1d   :  { %s936_s2 = scalar_lea.vmem %s32_s13, 64  ;;  %p941_p12 = scmp.lt.s32.totalorder %s32_s13, %s32_s13 }
  0x1e   :  { %p937_p11 = scmp.ne.s32.totalorder %s32_s13, %s936_s2  ;;  %p942_p13 = scmp.lt.s32.totalorder %s936_s2, %s936_s2 }
  0x20   :  { %p943_p0 = por %p942_p13, %p941_p12 }
  0x22   :  { %p944_p1 = pnand %p943_p0, %p937_p11 }
  0x24   :  { %947 = shalt.err (!%p944_p1)
}
  0x25   :  { %34 = dma.hbm_to_vmem [thread:$0]  %s1294_s1, 64, %s32_s13, [#allocation8]  }
  0x26   :  { %s948_s27 = scalar_lea.hbm %s1296_s3, 256 }
  0x27   :  { %p949_p2 = scmp.ne.s32.totalorder %s1296_s3, %s948_s27  ;;  %p952_p3 = scmp.lt.u32.totalorder %s948_s27, %s1296_s3 }
  0x29   :  { %p954_p4 = pnand %p952_p3, %p949_p2 }
  0x2b   :  { %957 = shalt.err (!%p954_p4)
}
  0x2c   :  { %s958_s14 = scalar_lea.vmem %s53_s15, 256  ;;  %p963_p6 = scmp.lt.s32.totalorder %s53_s15, %s53_s15 }
  0x2d   :  { %p959_p5 = scmp.ne.s32.totalorder %s53_s15, %s958_s14  ;;  %p964_p7 = scmp.lt.s32.totalorder %s958_s14, %s958_s14 }
  0x2f   :  { %p965_p8 = por %p964_p7, %p963_p6 }
  0x31   :  { %p966_p9 = pnand %p965_p8, %p959_p5 }
  0x33   :  { %969 = shalt.err (!%p966_p9)
}
  0x34   :  { %s1073_s1 = smov 64   ;;  %s1074_s13 = smov 4  }
  0x35   :  { %58 = dma.hbm_to_vmem [thread:$0]  %s1296_s3, 256, %s53_s15, [#allocation11], %s1073_s1, %s1073_s1, %s1074_s13  }
  0x36   :  { %s1075_s19 = smov [#allocation13]   ;;  %s970_s23 = scalar_lea.hbm %s1298_s5, 512 }
  0x37   :  { %s66_s20 = sshll.u32 %s1075_s19, 4  ;;  %p971_p10 = scmp.ne.s32.totalorder %s1298_s5, %s970_s23  ;;  %s67_s20 = int_to_ptr.vmem [resolvable:$true] %s66_s20 }
  0x38   :  { %p974_p11 = scmp.lt.u32.totalorder %s970_s23, %s1298_s5 }
  0x3a   :  { %p976_p12 = pnand %p974_p11, %p971_p10 }
  0x3c   :  { %979 = shalt.err (!%p976_p12)
}
  0x3d   :  { %s980_s26 = scalar_lea.vmem %s67_s20, 512  ;;  %p985_p0 = scmp.lt.s32.totalorder %s67_s20, %s67_s20 }
  0x3e   :  { %p981_p13 = scmp.ne.s32.totalorder %s67_s20, %s980_s26  ;;  %p986_p1 = scmp.lt.s32.totalorder %s980_s26, %s980_s26 }
  0x40   :  { %p987_p2 = por %p986_p1, %p985_p0 }
  0x42   :  { %p988_p3 = pnand %p987_p2, %p981_p13 }
  0x44   :  { %991 = shalt.err (!%p988_p3)
}
  0x45   :  { %s1076_s3 = smov 128   ;;  %s1077_s15 = smov 8  }
  0x46   :  { %72 = dma.hbm_to_vmem [thread:$0]  %s1298_s5, 512, %s67_s20, [#allocation14], %s1076_s3, %s1076_s3, %s1077_s15  }
  0x47   :  { %1058 = dma.done.wait [#allocation8], 64  }
  0x48   :  { %1059 = vsyncadd [#allocation8], 4294967232 }
  0x49   :  { %1060 = dma.done.wait [#allocation11], 512  }
  0x4a   :  { %1061 = vsyncadd [#allocation11], 4294966784 }
  0x4b   :  { %1062 = dma.done.wait [#allocation14], 512  }
  0x4c   :  { %1063 = vsyncadd [#allocation14], 4294966784  ;;  %v1078_v0 = vmov 0.0|0.0   ;;  %vm1079_vm0 = vmmov 0   ;;  %v1080_v1 = vmov 0.0   ;;  %v94_v2 = vld [vmem:[#allocation13] sm:$0xff]  ;;  %v276_v63 = vlaneseq }
  0x4d   :  { %855 = vmatprep.subr.bf16.mxu0 %v1078_v0  ;;  %832 = vmatprep.mubr.msk.f32.mxu0 %vm1079_vm0, %v1080_v1  ;;  %v95_v3 = vld [vmem:[#allocation13 + $0x8] sm:$0xff]  ;;  %v96_v4 = vld [vmem:[#allocation13 + $0x10] sm:$0xff]  ;;  %v97_v6 = vld [vmem:[#allocation13 + $0x18] sm:$0xff]  ;;  %vm105_vm1 = vcmask 261120   ;;  %vm179_vm2 = vcmask 257024   ;;  %vm310_vm3 = vcmask 1041409  }
  0x4e   :  { %835 = vmatprep.subr.mxu1 %v1080_v1  ;;  %837 = vmatprep.mubr.msk.f32.mxu1 %vm1079_vm0, %v1080_v1  ;;  %v856_v5 = vpack.c.bf16 %v95_v3, %v94_v2  ;;  %v859_v7 = vpack.c.bf16 %v97_v6, %v96_v4  ;;  %v93_v8 = vld [vmem:[#allocation7] sm:$0xf]  ;;  %181 = vst.msk [vmem:[#allocation3] sm:$0xf] %vm179_vm2, %v1080_v1  ;;  %v795_v9 = vld [vmem:[%s1299_s6] ss:$0 sm:$0xff]  ;;  %v259_v4 = vstv %s1293_s0 }
  0x4f   :  { %v187_v13 = vld [vmem:[#allocation10 + $0x4] sm:$0x3]  ;;  %v185_v14 = vld [vmem:[#allocation10] sm:$0x3]  ;;  %v188_v15 = vld [vmem:[#allocation10 + $0x6] sm:$0x3] }
  0x50   :  { %857 = vmatpush3.bf16.msra.mxu0 %v856_v5  ;;  %v186_v16 = vld [vmem:[#allocation10 + $0x2] sm:$0x3]  ;;  %v190_v17 = vld [vmem:[#allocation10 + $0xa] sm:$0x3]  ;;  %v195_v18 = vunpack.c.l.bf16 %v187_v13  ;;  %v193_v19 = vunpack.c.l.bf16 %v185_v14  ;;  %v196_v20 = vunpack.c.l.bf16 %v188_v15  ;;  %v189_v21 = vld [vmem:[#allocation10 + $0x8] sm:$0x3] }
  0x51   :  { %858 = vmatprep.subr.bf16.mxu0 %v1078_v0  ;;  %v194_v22 = vunpack.c.l.bf16 %v186_v16  ;;  %v198_v23 = vunpack.c.l.bf16 %v190_v17  ;;  %v197_v25 = vunpack.c.l.bf16 %v189_v21  ;;  %v192_v26 = vld [vmem:[#allocation10 + $0xe] sm:$0x3]  ;;  %v191_v30 = vld [vmem:[#allocation10 + $0xc] sm:$0x3]  ;;  %v277_v0 = vand.u32 127, %v276_v63  ;;  %s1084_s13 = smov [#allocation16]  }
  0x52   :  { %v200_v33 = vunpack.c.l.bf16 %v192_v26  ;;  %v199_v35 = vunpack.c.l.bf16 %v191_v30  ;;  %v797_v38 = vld [vmem:[%s1300_s7] ss:$0 sm:$0xff]  ;;  %v1220_v2 = vshrl.u32 %v276_v63, 7  ;;  %vm312_vm4 = vcmask 1042434   ;;  %s763_s16 = sshll.u32 %s1084_s13, 4  ;;  %s1085_s17 = smov [#allocation15]   ;;  %s764_s16 = int_to_ptr.vmem [resolvable:$true] %s763_s16 }
  0x53   :  { %vm314_vm5 = vcmask 1043459   ;;  %vm316_vm6 = vcmask 1044484   ;;  %vm318_vm7 = vcmask 1045509   ;;  %vm320_vm8 = vcmask 1046534   ;;  %s753_s19 = sshll.u32 %s1085_s17, 4  ;;  %s992_s20 = scalar_lea.vmem %s764_s16, 64  ;;  %s754_s19 = int_to_ptr.vmem [resolvable:$true] %s753_s19 }
  0x54   :  { %860 = vmatpush3.bf16.msra.mxu0 %v859_v7  ;;  %v280_v6 = vsub.s32 %v277_v0, %v1220_v2  ;;  %vm322_vm9 = vcmask 1047559   ;;  %vm182_vm10 = vcmask 3072   ;;  %vm361_vm12 = vcmask 60416   ;;  %p993_p4 = scmp.ne.s32.totalorder %s764_s16, %s992_s20  ;;  %p997_p5 = scmp.lt.s32.totalorder %s764_s16, %s764_s16 }
  0x55   :  { %850 = vmatprep.subr.mxu0 %v1080_v1  ;;  %183 = vst.msk [vmem:[#allocation4] sm:$0xf] %vm182_vm10, %v1080_v1  ;;  %vm422_vm13 = vcmask 64512   ;;  %p998_p6 = scmp.lt.s32.totalorder %s992_s20, %s992_s20 }
  0x57   :  { %833 = vmatmul.mubr.msk.f32.vlgmr.msra.gmra.mrb[0].mxu0 %vm105_vm1, %v93_v8  ;;  %p999_p7 = por %p998_p6, %p997_p5 }
  0x58   :  { %852 = vmatprep.mubr.msk.f32.mxu0 %vm1079_vm0, %v1080_v1 }
  0x59   :  { %p1000_p8 = pnand %p999_p7, %p993_p4 }
 0x12a   :  { %v175_v10 = vpop.f32.mrb[0].mxu0 }
 0x12b   :  { %v176_v11 = vadd.f32 %v795_v9, %v175_v10  ;;  %v834_v12 = vpop.f32.mrb[1].mxu0 }
 0x12d   :  { %180 = vst.msk [vmem:[#allocation2] sm:$0xf] %vm179_vm2, %v176_v11 }
 0x134   :  { %v201_v24 = vld [vmem:[#allocation2] sm:$0xf] }
 0x135   :  { %v204_v27 = vadd.f32 %v201_v24, %v195_v18  ;;  %v202_v28 = vadd.f32 %v201_v24, %v193_v19  ;;  %v205_v29 = vadd.f32 %v201_v24, %v196_v20  ;;  %v203_v31 = vadd.f32 %v201_v24, %v194_v22 }
 0x136   :  { %v207_v32 = vadd.f32 %v201_v24, %v198_v23  ;;  %v206_v34 = vadd.f32 %v201_v24, %v197_v25  ;;  %v209_v36 = vadd.f32 %v201_v24, %v200_v33  ;;  %v208_v37 = vadd.f32 %v201_v24, %v199_v35 }
 0x137   :  { %882 = vtanh.f32 %v204_v27 }
 0x138   :  { %884 = vtanh.f32 %v202_v28 }
 0x139   :  { %886 = vtanh.f32 %v205_v29 }
 0x13a   :  { %888 = vtanh.f32 %v203_v31 }
 0x13b   :  { %890 = vtanh.f32 %v207_v32 }
 0x13c   :  { %892 = vtanh.f32 %v206_v34 }
 0x13d   :  { %894 = vtanh.f32 %v209_v36  ;;  %v1081_v36 = vmov -1e+30  }
 0x13e   :  { %896 = vtanh.f32 %v208_v37  ;;  %184 = vst.msk [vmem:[#allocation5] sm:$0xf] %vm182_vm10, %v1081_v36  ;;  %v357_v37 = vld [vmem:[%s1297_s4] sm:$0xf] }
 0x13f   :  { %vm358_vm11 = vcmp.gt.f32.partialorder %v357_v37, 0.0 }
 0x141   :  { %v883_v39 = vpop.eup %882 }
 0x142   :  { %v885_v40 = vpop.eup %884  ;;  %v227_v41 = vmul.f32 %v883_v39, %v797_v38 }
 0x143   :  { %v887_v42 = vpop.eup %886  ;;  %v225_v43 = vmul.f32 %v885_v40, %v797_v38 }
 0x144   :  { %v889_v44 = vpop.eup %888  ;;  %v240_v45 = vsel %vm179_vm2, %v227_v41, 0.0  ;;  %v228_v46 = vmul.f32 %v887_v42, %v797_v38  ;;  %v1082_v41 = vmov 0  }
 0x145   :  { %v891_v47 = vpop.eup %890  ;;  %241 = vadd.xlane.f32.xlu1 %v240_v45  ;;  %v234_v48 = vsel %vm179_vm2, %v225_v43, 0.0  ;;  %v226_v49 = vmul.f32 %v889_v44, %v797_v38  ;;  %v360_v42 = vld [vmem:[#allocation5] sm:$0xf] }
 0x146   :  { %v893_v50 = vpop.eup %892  ;;  %235 = vadd.xlane.f32.xlu0 %v234_v48  ;;  %v243_v51 = vsel %vm179_vm2, %v228_v46, 0.0  ;;  %v230_v52 = vmul.f32 %v891_v47, %v797_v38  ;;  %880 = vset.pattern.permute.xlu1 %v1082_v41  ;;  %v803_v48 = vld [vmem:[#allocation12] sm:$0xff]  }
 0x147   :  { %v895_v53 = vpop.eup %894  ;;  %v237_v54 = vsel %vm179_vm2, %v226_v49, 0.0  ;;  %v229_v55 = vmul.f32 %v893_v50, %v797_v38  ;;  %v804_v49 = vunpack.c.l.bf16 %v803_v48  ;;  %v810_v50 = vld [vmem:[#allocation12 + $0x8] sm:$0xff]   ;;  %v805_v63 = vunpack.c.h.bf16 %v803_v48 }
 0x148   :  { %v897_v56 = vpop.eup %896  ;;  %v249_v57 = vsel %vm179_vm2, %v230_v52, 0.0  ;;  %v232_v58 = vmul.f32 %v895_v53, %v797_v38 }
 0x149   :  { %244 = vadd.xlane.f32.xlu1 %v243_v51  ;;  %v246_v59 = vsel %vm179_vm2, %v229_v55, 0.0  ;;  %v231_v60 = vmul.f32 %v897_v56, %v797_v38  ;;  %836 = vmatpush3.msra.mxu1 %v804_v49  ;;  %v809_v51 = vunpack.c.h.bf16 %v810_v50  ;;  %v1083_v55 = vmov 1966171168  }
 0x14a   :  { %238 = vadd.xlane.f32.xlu0 %v237_v54  ;;  %v255_v61 = vsel %vm179_vm2, %v232_v58, 0.0  ;;  %840 = vmatprep.subr.mxu1 %v1080_v1  ;;  %v399_v56 = vunpack.c.l.s4 %v1083_v55 }
 0x14b   :  { %v252_v62 = vsel %vm179_vm2, %v231_v60, 0.0  ;;  %851 = vmatpush3.msra.mxu0 %v809_v51 }
 0x14d   :  { %250 = vadd.xlane.f32.xlu1 %v249_v57  ;;  %v400_v57 = vunpack.c.0.s8 %v399_v56 }
 0x14e   :  { %247 = vadd.xlane.f32.xlu0 %v246_v59 }
 0x14f   :  { %v403_v58 = vsub.s32 %v400_v57, %v1220_v2 }
 0x151   :  { %256 = vadd.xlane.f32.xlu1 %v255_v61 }
 0x152   :  { %253 = vadd.xlane.f32.xlu0 %v252_v62 }
 0x1d2   :  { %v242_v3 = vpop.xlane.xlu1 %241 }
 0x1d3   :  { %v236_v5 = vpop.xlane.xlu0 %235  ;;  %v262_v9 = vadd.f32 %v259_v4, %v242_v3 }
 0x1d4   :  { %v260_v7 = vadd.f32 %v259_v4, %v236_v5  ;;  %v808_v5 = vunpack.c.l.bf16 %v810_v50 }
 0x1d5   :  { %v289_v16 = vrot.slane %v262_v9, %v280_v6 }
 0x1d6   :  { %v245_v8 = vpop.xlane.xlu1 %244  ;;  %v281_v13 = vrot.slane %v260_v7, %v280_v6  ;;  %v378_v7 = vld [vmem:[#allocation4] sm:$0xf] }
 0x1d7   :  { %v239_v10 = vpop.xlane.xlu0 %238  ;;  %v263_v11 = vadd.f32 %v259_v4, %v245_v8 }
 0x1d8   :  { %v261_v12 = vadd.f32 %v259_v4, %v239_v10 }
 0x1d9   :  { %v293_v19 = vrot.slane %v263_v11, %v280_v6 }
 0x1da   :  { %v285_v14 = vrot.slane %v261_v12, %v280_v6  ;;  %v251_v15 = vpop.xlane.xlu1 %250 }
 0x1db   :  { %v265_v17 = vadd.f32 %v259_v4, %v251_v15  ;;  %v248_v18 = vpop.xlane.xlu0 %247 }
 0x1dc   :  { %v311_v20 = vsel %vm310_vm3, %v285_v14, %v281_v13  ;;  %v264_v21 = vadd.f32 %v259_v4, %v248_v18 }
 0x1dd   :  { %v313_v22 = vsel %vm312_vm4, %v289_v16, %v311_v20  ;;  %v301_v26 = vrot.slane %v265_v17, %v280_v6 }
 0x1de   :  { %v315_v23 = vsel %vm314_vm5, %v293_v19, %v313_v22  ;;  %v297_v24 = vrot.slane %v264_v21, %v280_v6  ;;  %v257_v25 = vpop.xlane.xlu1 %256 }
 0x1df   :  { %v267_v27 = vadd.f32 %v259_v4, %v257_v25  ;;  %v254_v28 = vpop.xlane.xlu0 %253 }
 0x1e0   :  { %v317_v29 = vsel %vm316_vm6, %v297_v24, %v315_v23  ;;  %v266_v30 = vadd.f32 %v259_v4, %v254_v28 }
 0x1e1   :  { %v309_v31 = vrot.slane %v267_v27, %v280_v6  ;;  %v319_v33 = vsel %vm318_vm7, %v301_v26, %v317_v29 }
 0x1e2   :  { %v305_v32 = vrot.slane %v266_v30, %v280_v6 }
 0x1e4   :  { %v321_v34 = vsel %vm320_vm8, %v305_v32, %v319_v33 }
 0x1e5   :  { %v323_v35 = vsel %vm322_vm9, %v309_v31, %v321_v34 }
 0x1e6   :  { %325 = vxpose.xlu0.b32.start.end [1/1] (short) (narrow) %v323_v35, 8 }
 0x20f   :  { %881 = vset.pattern.permute.xlu0 %v1082_v41 }
 0x266   :  { %v341_v38 = vpop.trf.xlu0 }
 0x267   :  { %v359_v39 = vsel %vm358_vm11, %v341_v38, -1e+30 }
 0x268   :  { %v362_v40 = vsel %vm361_vm12, %v359_v39, -inf }
 0x269   :  { %363 = vmax.xlane.f32.xlu1 %v362_v40 }
 0x2f6   :  { %v364_v43 = vpop.xlane.xlu1 %363 }
 0x2f7   :  { %v365_v44 = vmax.f32 %v360_v42, %v364_v43 }
 0x2f9   :  { %v366_v45 = vsub.f32 %v360_v42, %v365_v44  ;;  %386 = vst.msk [vmem:[#allocation5] sm:$0xf] %vm182_vm10, %v365_v44  ;;  %371 = vperm.xlu1 %880, %v365_v44  }
 0x2fb   :  { %v367_v46 = vmul.f32 1.442695, %v366_v45 }
 0x2fd   :  { %898 = vpow2.f32 %v367_v46 }
 0x307   :  { %v899_v47 = vpop.eup %898 }
 0x308   :  { %714 = vperm.xlu0 %881, %v899_v47   ;;  %v379_v8 = vmul.f32 %v899_v47, %v378_v7 }
 0x378   :  { %v372_v52 = vpop.permute.xlu1 %371 }
 0x379   :  { %v374_v53 = vsub.f32 %v359_v39, %v372_v52  ;;  %388 = vst.msk [vmem:[#allocation16] sm:$0xf] %vm361_vm12, %v372_v52 }
 0x37b   :  { %v375_v54 = vmul.f32 1.442695, %v374_v53 }
 0x37d   :  { %900 = vpow2.f32 %v375_v54 }
 0x387   :  { %v901_v59 = vpop.eup %900 }
 0x388   :  { %v377_v60 = vmul.f32 %v901_v59, %v357_v37 }
 0x38a   :  { %v380_v61 = vsel %vm361_vm12, %v377_v60, 0.0  ;;  %387 = vst.msk [vmem:[#allocation15] sm:$0xf] %vm361_vm12, %v377_v60  ;;  %v404_v62 = vrot.slane %v377_v60, %v403_v58 }
 0x38b   :  { %381 = vadd.xlane.f32.xlu1 %v380_v61 }
 0x38c   :  { %v405_v0 = vcombine.high %v404_v62, %v404_v62  ;;  %v412_v3 = vrot.slane %v404_v62, %v403_v58 }
 0x38e   :  { %838 = vmatmul.mubr.msk.f32.vlgmr.msra.gmra.mrb[0].mxu1 %vm422_vm13, %v412_v3  ;;  %v419_v4 = vrot.slane %v405_v0, %v403_v58  ;;  %v420_v6 = vcombine.high %v412_v3, %v412_v3 }
 0x38f   :  { %841 = vmatpush3.msra.mxu1 %v805_v63  ;;  %842 = vmatprep.mubr.msk.f32.mxu1 %vm1079_vm0, %v1080_v1 }
 0x390   :  { %v421_v2 = vcombine.high %v419_v4, %v419_v4  ;;  %845 = vmatprep.subr.mxu1 %v1080_v1 }
 0x392   :  { %843 = vmatmul.mubr.msk.f32.vlgmr.msra.gmra.mrb[2].mxu1 %vm422_vm13, %v419_v4  ;;  %853 = vmatmul.mubr.msk.f32.vlgmr.msra.gmra.mrb[2].mxu0 %vm422_vm13, %v421_v2 }
 0x393   :  { %846 = vmatpush3.msra.mxu1 %v808_v5  ;;  %847 = vmatprep.mubr.msk.f32.mxu1 %vm1079_vm0, %v1080_v1 }
 0x396   :  { %848 = vmatmul.mubr.msk.f32.vlgmr.msra.gmra.mrb[4].mxu1 %vm422_vm13, %v420_v6 }
 0x418   :  { %v382_v9 = vpop.xlane.xlu1 %381 }
 0x419   :  { %v383_v10 = vadd.f32 %v382_v9, %v379_v8 }
 0x41b   :  { %385 = vst.msk [vmem:[#allocation4] sm:$0xf] %vm182_vm10, %v383_v10 }
 0x422   :  { %v745_v11 = vld [vmem:[#allocation4] sm:$0xf] }
 0x423   :  { %v734_v12 = vld [vmem:[#allocation4] sm:$0xf]  ;;  %746 = vst.msk [vmem:[%s1303_s10] sm:$0xf] %vm182_vm10, %v745_v11 }
 0x424   :  { %v735_v13 = vmax.f32 %v734_v12, 1e-30 }
 0x426   :  { %739 = vperm.xlu1 %880, %v735_v13  }
 0x427   :  { %1003 = shalt.err (!%p1000_p8)
}
 0x428   :  { %s1004_s23 = scalar_lea.hbm %s1302_s9, 64 }
 0x429   :  { %p1005_p9 = scmp.ne.s32.totalorder %s1302_s9, %s1004_s23  ;;  %p1008_p10 = scmp.lt.u32.totalorder %s1004_s23, %s1302_s9 }
 0x42b   :  { %p1010_p11 = pnand %p1008_p10, %p1005_p9 }
 0x42d   :  { %1013 = shalt.err (!%p1010_p11)
}
 0x42e   :  { %766 = dma.vmem_to_hbm [thread:$0]  %s764_s16, 64, %s1302_s9, [#allocation17]  }
 0x42f   :  { %s1014_s3 = scalar_lea.vmem %s754_s19, 64  ;;  %p1019_p13 = scmp.lt.s32.totalorder %s754_s19, %s754_s19 }
 0x430   :  { %p1015_p12 = scmp.ne.s32.totalorder %s754_s19, %s1014_s3  ;;  %p1020_p0 = scmp.lt.s32.totalorder %s1014_s3, %s1014_s3 }
 0x432   :  { %p1021_p1 = por %p1020_p0, %p1019_p13 }
 0x434   :  { %p1022_p2 = pnand %p1021_p1, %p1015_p12 }
 0x436   :  { %1025 = shalt.err (!%p1022_p2)
}
 0x437   :  { %s1026_s28 = scalar_lea.hbm %s1301_s8, 64 }
 0x438   :  { %p1027_p3 = scmp.ne.s32.totalorder %s1301_s8, %s1026_s28  ;;  %p1030_p4 = scmp.lt.u32.totalorder %s1026_s28, %s1301_s8 }
 0x43a   :  { %p1032_p5 = pnand %p1030_p4, %p1027_p3 }
 0x43c   :  { %1035 = shalt.err (!%p1032_p5)
}
 0x43d   :  { %756 = dma.vmem_to_hbm [thread:$0]  %s754_s19, 64, %s1301_s8, [#allocation9]   ;;  %v711_v21 = vld [vmem:[#allocation3] sm:$0xf]  ;;  %v715_v22 = vpop.permute.xlu0 %714 }
 0x43e   :  { %v717_v27 = vmul.f32 %v715_v22, %v711_v21  ;;  %s1086_s8 = smov [#allocation18]  }
 0x43f   :  { %s775_s12 = sshll.u32 %s1086_s8, 4  ;;  %s776_s12 = int_to_ptr.vmem [resolvable:$true] %s775_s12 }
 0x440   :  { %s1036_s0 = scalar_lea.vmem %s776_s12, 64  ;;  %p1041_p7 = scmp.lt.s32.totalorder %s776_s12, %s776_s12 }
 0x441   :  { %p1037_p6 = scmp.ne.s32.totalorder %s776_s12, %s1036_s0  ;;  %p1042_p8 = scmp.lt.s32.totalorder %s1036_s0, %s1036_s0 }
 0x443   :  { %p1043_p9 = por %p1042_p8, %p1041_p7 }
 0x445   :  { %p1044_p10 = pnand %p1043_p9, %p1037_p6 }
 0x461   :  { %v491_v1 = vpop.f32.mrb[0].mxu1 }
 0x462   :  { %v839_v14 = vpop.f32.mrb[1].mxu1 }
 0x465   :  { %v563_v15 = vpop.f32.mrb[2].mxu1  ;;  %v707_v16 = vpop.f32.mrb[2].mxu0 }
 0x466   :  { %v722_v17 = vrot.slane %v563_v15, 7  ;;  %v844_v18 = vpop.f32.mrb[3].mxu1  ;;  %v854_v19 = vpop.f32.mrb[3].mxu0  ;;  %v726_v26 = vrot.slane %v707_v16, 5 }
 0x468   :  { %v723_v20 = vsel %vm310_vm3, %v722_v17, %v491_v1 }
 0x469   :  { %v635_v23 = vpop.f32.mrb[4].mxu1 }
 0x46a   :  { %v724_v24 = vrot.slane %v635_v23, 6  ;;  %v849_v25 = vpop.f32.mrb[5].mxu1 }
 0x46c   :  { %v725_v28 = vsel %vm312_vm4, %v724_v24, %v723_v20 }
 0x46d   :  { %v727_v29 = vsel %vm314_vm5, %v726_v26, %v725_v28 }
 0x46e   :  { %v729_v30 = vadd.f32 %v727_v29, %v717_v27 }
 0x470   :  { %730 = vst.msk [vmem:[#allocation3] sm:$0xf] %vm179_vm2, %v729_v30 }
 0x477   :  { %v736_v33 = vld [vmem:[#allocation3] sm:$0xf] }
 0x4a5   :  { %v740_v31 = vpop.permute.xlu1 %739 }
 0x4a6   :  { %902 = vrcp.f32 %v740_v31 }
 0x4b0   :  { %v903_v32 = vpop.eup %902 }
 0x4b1   :  { %v743_v34 = vmul.f32 %v903_v32, %v736_v33 }
 0x4b3   :  { %744 = vst.msk [vmem:[#allocation18] sm:$0xf] %vm179_vm2, %v743_v34 }
 0x4b4   :  { %1047 = shalt.err (!%p1044_p10)
}
 0x4b5   :  { %s1048_s1 = scalar_lea.hbm %s1304_s11, 64 }
 0x4b6   :  { %p1049_p11 = scmp.ne.s32.totalorder %s1304_s11, %s1048_s1  ;;  %p1052_p12 = scmp.lt.u32.totalorder %s1048_s1, %s1304_s11 }
 0x4b8   :  { %p1054_p13 = pnand %p1052_p12, %p1049_p11 }
 0x4ba   :  { %1057 = shalt.err (!%p1054_p13)
}
 0x4bb   :  { %778 = dma.vmem_to_hbm [thread:$0]  %s776_s12, 64, %s1304_s11, [#allocation17]  }
 0x4bc   :  { %1064 = dma.done.wait [#allocation9], 64  }
 0x4bd   :  { %1065 = vsyncadd [#allocation9], 4294967232 }
 0x4be   :  { %1066 = dma.done.wait [#allocation17], 128  }
 0x4bf   :  { %1067 = vsyncadd [#allocation17], 4294967168 }
 0x4c0   :  { %790 = vsyncpa [#allocation8], 1 }
 0x4c1   :  { %791 = vsyncpa [#allocation11], 1 }
 0x4c2   :  { %792 = vsyncpa [#allocation14], 1 }
 0x4c3   :  { %793 = vsyncpa [#allocation9], 1 }
 0x4c4   :  { %794 = vsyncpa [#allocation17], 1 }

</bundles_post_ra>
